<compile_context>
chip_gen: v7x
topology: tpu7x:2x2x1
jax: 0.10.0
libtpu: 0.0.40
codegen_flags: <defaults>
</compile_context>

<pallas_src>
import functools
import math

import jax
import jax.numpy as jnp
import numpy as np
from jax.experimental import pallas as pl
from jax.experimental.pallas import tpu as pltpu

LN_EPS = 1e-5


# ---------------------------------------------------------------------------
# Fused Pallas kernel
# ---------------------------------------------------------------------------
def _layernorm(x, w, b):
    mu = jnp.mean(x, axis=-1, keepdims=True)
    xc = x - mu
    var = jnp.mean(xc * xc, axis=-1, keepdims=True)
    return xc * jax.lax.rsqrt(var + LN_EPS) * w + b


def fused_transformer_kernel(src_ref, pe_ref, w_ref, vec_ref, o_ref,
                             *, B, S, D, dff, nhead, num_layers):
    """Full forward pass: scale + PE, post-norm encoder layers, linear head.

    w_ref[l] rows:   [0:D)=Wqkv^T (Q cols pre-scaled), [D:2D)=Wo^T,
                     [2D:3D)=W1^T, [3D:3D+dff)=W2^T      (lane-padded to 96)
    vec_ref[l] rows: 0=bqkv(scaled Q part) 1=b1 2=bo 3=b2
                     4=ln1_w 5=ln1_b 6=ln2_w 7=ln2_b 8=dec_w 9=dec_b
    """
    N = B * S
    hd = D // nhead

    # input scaling + positional encoding (pe pre-broadcast to (N, D) host-side)
    x = src_ref[...] * math.sqrt(D) + pe_ref[...]                       # (N, D) f32

    for l in range(num_layers):                                         # static layer loop
        # ---- multi-head self-attention (scale already folded into Wq/bq) ----
        qkv = (jnp.dot(x, w_ref[l, 0:D, 0:3 * D],
                       preferred_element_type=jnp.float32)
               + vec_ref[l, 0:1, 0:3 * D])                              # (N, 3D)
        q3 = qkv[:, 0:D].reshape(B, S, D)
        k3 = qkv[:, D:2 * D].reshape(B, S, D)
        v3 = qkv[:, 2 * D:3 * D].reshape(B, S, D)

        attn = jnp.zeros((N, D), jnp.float32)
        for h in range(nhead):                                          # static head loop
            sl = slice(h * hd, (h + 1) * hd)
            s = jnp.einsum('bqd,bkd->bqk', q3[:, :, sl], k3[:, :, sl],
                           preferred_element_type=jnp.float32)          # (B, S, S)
            s = s - jnp.max(s, axis=-1, keepdims=True)
            p = jnp.exp(s)
            denom = jnp.sum(p, axis=-1, keepdims=True)
            # EUP approximate reciprocal + one Newton step (keeps f32-level accuracy).
            inv = pl.reciprocal(denom, approx=True)
            inv = inv * (2.0 - denom * inv)
            ho = jnp.einsum('bqk,bkd->bqd', p * inv, v3[:, :, sl],
                            preferred_element_type=jnp.float32).reshape(N, hd)
            # accumulate this head directly through its rows of Wo^T (no lane concat)
            attn = attn + jnp.dot(ho, w_ref[l, D + h * hd:D + (h + 1) * hd, 0:D],
                                  preferred_element_type=jnp.float32)
        attn = attn + vec_ref[l, 2:3, 0:D]                              # + bo

        # residual + norm1  (dropout1 == identity in eval)
        x = _layernorm(x + attn, vec_ref[l, 4:5, 0:D], vec_ref[l, 5:6, 0:D])

        # Only the last token feeds the head, and FFN/LN2 are position-wise:
        # drop all other rows before the final layer's FFN (exact).
        if l == num_layers - 1:
            x = x.reshape(B, S, D)[:, S - 1, :]                         # (B, D)

        # ---- feed-forward ----
        h1 = (jnp.dot(x, w_ref[l, 2 * D:3 * D, 0:dff],
                      preferred_element_type=jnp.float32)
              + vec_ref[l, 1:2, 0:dff])
        h1 = jnp.maximum(h1, 0.0)                                       # relu
        h2 = (jnp.dot(h1, w_ref[l, 3 * D:3 * D + dff, 0:D],
                      preferred_element_type=jnp.float32)
              + vec_ref[l, 3:4, 0:D])

        # residual + norm2  (dropout2 == identity in eval)
        x = _layernorm(x + h2, vec_ref[l, 6:7, 0:D], vec_ref[l, 7:8, 0:D])

    # ---- decoder head on last-token features:  out = x_last . dec_w + dec_b ----
    dec_w = vec_ref[num_layers - 1, 8:9, 0:D]                           # (1, D)
    dec_b = vec_ref[num_layers - 1, 9:10, 0:1]                          # (1, 1)
    o_ref[...] = (jnp.sum(x * dec_w, axis=-1, keepdims=True) + dec_b).astype(o_ref.dtype)


# ---------------------------------------------------------------------------
# Wrapper / host-side parameter packing (done once)
# ---------------------------------------------------------------------------
def pack_params(params, pe, B, S, nhead):
    """Pre-transpose + pack all weights into two per-layer slabs; fold attn scale."""
    layers = params["layers"]
    L = len(layers)
    D = layers[0]["wo"].shape[0]
    dff = layers[0]["w1"].shape[0]
    hd = D // nhead
    scale = 1.0 / math.sqrt(hd)
    VW = max(3 * D, dff)                       # common lane width of the packed slabs

    big_w = np.zeros((L, 3 * D + dff, VW), np.float32)
    vecs = np.zeros((L, 16, VW), np.float32)
    for l, p in enumerate(layers):
        wqkv_t = np.asarray(p["wqkv"], np.float32).T.copy()             # (D, 3D)
        wqkv_t[:, :D] *= scale                                          # fold 1/sqrt(hd)
        big_w[l, 0:D, 0:3 * D] = wqkv_t
        big_w[l, D:2 * D, 0:D] = np.asarray(p["wo"], np.float32).T
        big_w[l, 2 * D:3 * D, 0:dff] = np.asarray(p["w1"], np.float32).T
        big_w[l, 3 * D:3 * D + dff, 0:D] = np.asarray(p["w2"], np.float32).T

        bqkv = np.asarray(p["bqkv"], np.float32)[0].copy()              # (3D,)
        bqkv[:D] *= scale                                               # fold 1/sqrt(hd)
        vecs[l, 0, 0:3 * D] = bqkv
        vecs[l, 1, 0:dff] = np.asarray(p["b1"], np.float32)[0]
        vecs[l, 2, 0:D] = np.asarray(p["bo"], np.float32)[0]
        vecs[l, 3, 0:D] = np.asarray(p["b2"], np.float32)[0]
        vecs[l, 4, 0:D] = np.asarray(p["ln1_w"], np.float32)[0]
        vecs[l, 5, 0:D] = np.asarray(p["ln1_b"], np.float32)[0]
        vecs[l, 6, 0:D] = np.asarray(p["ln2_w"], np.float32)[0]
        vecs[l, 7, 0:D] = np.asarray(p["ln2_b"], np.float32)[0]
        vecs[l, 8, 0:D] = np.asarray(params["dec_w"], np.float32)[0]
        vecs[l, 9, 0] = np.asarray(params["dec_b"], np.float32)[0, 0]

    # PositionalEncoding quirk (batch_first): pe[:B] is (B,1,D) and broadcasts over seq.
    pe2d = np.broadcast_to(np.asarray(pe, np.float32)[:B], (B, S, D)).reshape(B * S, D)
    return {"big_w": jnp.asarray(big_w), "vecs": jnp.asarray(vecs),
            "pe2d": jnp.asarray(pe2d.copy())}


def transformer_forward(src, packed, dff, nhead, num_layers):
    B, S, D = src.shape
    src2 = src.reshape(B * S, D)

    kernel = functools.partial(fused_transformer_kernel, B=B, S=S, D=D, dff=dff,
                               nhead=nhead, num_layers=num_layers)
    vmem = pl.BlockSpec(memory_space=pltpu.MemorySpace.VMEM)            # full array in VMEM
    return pl.pallas_call(
        kernel,
        out_shape=jax.ShapeDtypeStruct((B, 1), jnp.float32),
        in_specs=[vmem, vmem, vmem, vmem],
        out_specs=vmem,
    )(src2, packed["pe2d"], packed["big_w"], packed["vecs"])


# ---------------------------------------------------------------------------
# Parameter / buffer construction (PyTorch conventions)
# ---------------------------------------------------------------------------
def make_positional_encoding(d_model, max_len=5000):
    """Replicates PositionalEncoding buffer: shape (max_len, 1, d_model)."""
    position = np.arange(0, max_len, dtype=np.float32)[:, None]
    div_term = np.exp(np.arange(0, d_model, 2, dtype=np.float32) * (-np.log(10000.0) / d_model))
    pe = np.zeros((max_len, d_model), dtype=np.float32)
    pe[:, 0::2] = np.sin(position * div_term)
    pe[:, 1::2] = np.cos(position * div_term)
    return jnp.asarray(pe[:, None, :])               # (max_len, 1, d_model)


def init_params(key, d_model, nhead, num_layers, dff):
    """Deterministic synthetic parameter init (PyTorch Linear convention: (out, in))."""
    params = {"layers": []}
    k = key
    for _ in range(num_layers):
        k, *ks = jax.random.split(k, 6)
        lp = {
            "wqkv": 0.05 * jax.random.normal(ks[0], (3 * d_model, d_model), jnp.float32),
            "bqkv": 0.05 * jax.random.normal(ks[1], (1, 3 * d_model), jnp.float32),
            "wo":   0.05 * jax.random.normal(ks[2], (d_model, d_model), jnp.float32),
            "bo":   jnp.zeros((1, d_model), jnp.float32),
            "w1":   0.05 * jax.random.normal(ks[3], (dff, d_model), jnp.float32),
            "b1":   jnp.zeros((1, dff), jnp.float32),
            "w2":   0.05 * jax.random.normal(ks[4], (d_model, dff), jnp.float32),
            "b2":   jnp.zeros((1, d_model), jnp.float32),
            "ln1_w": jnp.ones((1, d_model), jnp.float32),
            "ln1_b": jnp.zeros((1, d_model), jnp.float32),
            "ln2_w": jnp.ones((1, d_model), jnp.float32),
            "ln2_b": jnp.zeros((1, d_model), jnp.float32),
        }
        params["layers"].append(lp)
    k, kd = jax.random.split(k)
    params["dec_w"] = jax.random.uniform(kd, (1, d_model), jnp.float32, -0.1, 0.1)  # init_weights()
    params["dec_b"] = jnp.zeros((1, 1), jnp.float32)
    return params


# ---------------------------------------------------------------------------
# Pure-JAX reference (for verification)
# ---------------------------------------------------------------------------
def reference_forward(src, params, pe, d_model, nhead):
    B, S, D = src.shape
    hd = D // nhead
    x = src * np.sqrt(d_model).astype(np.float32) + pe[:B]
    for p in params["layers"]:
        qkv = x @ p["wqkv"].T + p["bqkv"][0]
        q, k, v = qkv[..., :D], qkv[..., D:2 * D], qkv[..., 2 * D:]
        q = q.reshape(B, S, nhead, hd).transpose(0, 2, 1, 3) / math.sqrt(hd)
        k = k.reshape(B, S, nhead, hd).transpose(0, 2, 1, 3)
        v = v.reshape(B, S, nhead, hd).transpose(0, 2, 1, 3)
        s = q @ k.transpose(0, 1, 3, 2)
        pattn = jax.nn.softmax(s, axis=-1)
        attn = (pattn @ v).transpose(0, 2, 1, 3).reshape(B, S, D)
        attn = attn @ p["wo"].T + p["bo"][0]
        x = x + attn
        mu = x.mean(-1, keepdims=True); var = ((x - mu) ** 2).mean(-1, keepdims=True)
        x = (x - mu) / jnp.sqrt(var + LN_EPS) * p["ln1_w"][0] + p["ln1_b"][0]
        h = jnp.maximum(x @ p["w1"].T + p["b1"][0], 0.0) @ p["w2"].T + p["b2"][0]
        x = x + h
        mu = x.mean(-1, keepdims=True); var = ((x - mu) ** 2).mean(-1, keepdims=True)
        x = (x - mu) / jnp.sqrt(var + LN_EPS) * p["ln2_w"][0] + p["ln2_b"][0]
    return x[:, -1, :] @ params["dec_w"].T + params["dec_b"][0]


# ---------------------------------------------------------------------------
if __name__ == "__main__":
    d_model, nhead, num_layers, dff = 32, 4, 2, 64
    B, S = 2, 8

    key = jax.random.PRNGKey(0)
    k_in, k_par = jax.random.split(key)
    src = jax.random.normal(k_in, (B, S, d_model), jnp.float32)

    params = init_params(k_par, d_model, nhead, num_layers, dff)
    pe = make_positional_encoding(d_model)
    packed = pack_params(params, pe, B, S, nhead)

    out = transformer_forward(src, packed, dff, nhead, num_layers)
    out = jax.block_until_ready(out)

    ref = reference_forward(src, params, pe, d_model, nhead)
    assert out.shape == (B, 1)
    np.testing.assert_allclose(np.asarray(out), np.asarray(ref), rtol=2e-4, atol=2e-4)

    print("KERNEL_OK")
</pallas_src>

<mosaic_0001>
module attributes {stable_mosaic.version = 11 : i64} {
  func.func @fused_transformer_kernel(%arg0: memref<16x32xf32, #tpu.memory_space<vmem>>, %arg1: memref<16x32xf32, #tpu.memory_space<vmem>>, %arg2: memref<2x160x96xf32, #tpu.memory_space<vmem>>, %arg3: memref<2x16x96xf32, #tpu.memory_space<vmem>>, %arg4: memref<2x1xf32, #tpu.memory_space<vmem>>) attributes {dimension_semantics = [], scalar_prefetch = 0 : i64, scratch_operands = 0 : i64, tpu.core_type = #tpu.core_type<tc>} {
    %c0 = arith.constant 0 : index
    %c0_0 = arith.constant 0 : index
    %0 = vector.load %arg0[%c0, %c0_0] : memref<16x32xf32, #tpu.memory_space<vmem>>, vector<16x32xf32>
    %cst = arith.constant 5.65685415 : f32
    %1 = vector.broadcast %cst : f32 to vector<16x32xf32>
    %2 = arith.mulf %0, %1 : vector<16x32xf32>
    %c0_1 = arith.constant 0 : index
    %c0_2 = arith.constant 0 : index
    %3 = vector.load %arg1[%c0_1, %c0_2] : memref<16x32xf32, #tpu.memory_space<vmem>>, vector<16x32xf32>
    %4 = arith.addf %2, %3 : vector<16x32xf32>
    %c0_3 = arith.constant 0 : index
    %c0_4 = arith.constant 0 : index
    %c0_5 = arith.constant 0 : index
    %5 = vector.load %arg2[%c0_3, %c0_4, %c0_5] : memref<2x160x96xf32, #tpu.memory_space<vmem>>, vector<1x32x96xf32>
    %6 = vector.shape_cast %5 : vector<1x32x96xf32> to vector<32x96xf32>
    %cst_6 = arith.constant dense<0.000000e+00> : vector<16x96xf32>
    %7 = tpu.matmul %4, %6, %cst_6 {dimension_numbers = #tpu.dot_dimension_numbers<[1], [0], [0], [1], [0, 0, 1, 1], [], []>} : vector<16x32xf32>, vector<32x96xf32>, vector<16x96xf32> -> vector<16x96xf32>
    %c0_7 = arith.constant 0 : index
    %c0_8 = arith.constant 0 : index
    %c0_9 = arith.constant 0 : index
    %8 = vector.load %arg3[%c0_7, %c0_8, %c0_9] : memref<2x16x96xf32, #tpu.memory_space<vmem>>, vector<1x1x96xf32>
    %9 = vector.shape_cast %8 : vector<1x1x96xf32> to vector<1x96xf32>
    %10 = vector.broadcast %9 : vector<1x96xf32> to vector<16x96xf32>
    %11 = arith.addf %7, %10 : vector<16x96xf32>
    %12 = vector.extract_strided_slice %11 {offsets = [0, 0], sizes = [16, 32], strides = [1, 1]} : vector<16x96xf32> to vector<16x32xf32>
    %13 = vector.shape_cast %12 : vector<16x32xf32> to vector<2x8x32xf32>
    %14 = vector.extract_strided_slice %11 {offsets = [0, 32], sizes = [16, 32], strides = [1, 1]} : vector<16x96xf32> to vector<16x32xf32>
    %15 = vector.shape_cast %14 : vector<16x32xf32> to vector<2x8x32xf32>
    %16 = vector.extract_strided_slice %11 {offsets = [0, 64], sizes = [16, 32], strides = [1, 1]} : vector<16x96xf32> to vector<16x32xf32>
    %17 = vector.shape_cast %16 : vector<16x32xf32> to vector<2x8x32xf32>
    %cst_10 = arith.constant 0.000000e+00 : f32
    %18 = vector.broadcast %cst_10 : f32 to vector<16x32xf32>
    %19 = vector.extract_strided_slice %13 {offsets = [0, 0, 0], sizes = [2, 8, 8], strides = [1, 1, 1]} : vector<2x8x32xf32> to vector<2x8x8xf32>
    %20 = vector.extract_strided_slice %15 {offsets = [0, 0, 0], sizes = [2, 8, 8], strides = [1, 1, 1]} : vector<2x8x32xf32> to vector<2x8x8xf32>
    "tpu.trace_start"() <{level = 10 : i32, message = "bqd,bkd->bqk"}> : () -> ()
    %cst_11 = arith.constant dense<0.000000e+00> : vector<2x8x8xf32>
    %21 = tpu.matmul %19, %20, %cst_11 {dimension_numbers = #tpu.dot_dimension_numbers<[2], [2], [1], [1], [0, 0, 0, 1, 1, 1], [0], [0]>} : vector<2x8x8xf32>, vector<2x8x8xf32>, vector<2x8x8xf32> -> vector<2x8x8xf32>
    "tpu.trace_stop"() : () -> ()
    %cst_12 = arith.constant dense<0xFF800000> : vector<2x8xf32>
    %22 = vector.multi_reduction <maximumf>, %21, %cst_12 [2] : vector<2x8x8xf32> to vector<2x8xf32>
    %23 = vector.shape_cast %22 : vector<2x8xf32> to vector<2x8x1xf32>
    %24 = vector.broadcast %23 : vector<2x8x1xf32> to vector<2x8x8xf32>
    %25 = arith.subf %21, %24 : vector<2x8x8xf32>
    %26 = math.exp %25 : vector<2x8x8xf32>
    %cst_13 = arith.constant dense<0.000000e+00> : vector<2x8xf32>
    %27 = vector.multi_reduction <add>, %26, %cst_13 [2] : vector<2x8x8xf32> to vector<2x8xf32>
    %28 = vector.shape_cast %27 : vector<2x8xf32> to vector<2x8x1xf32>
    %29 = tpu.reciprocal %28 {approx = true} : vector<2x8x1xf32> -> vector<2x8x1xf32>
    %30 = arith.mulf %28, %29 : vector<2x8x1xf32>
    %cst_14 = arith.constant 2.000000e+00 : f32
    %31 = vector.broadcast %cst_14 : f32 to vector<2x8x1xf32>
    %32 = arith.subf %31, %30 : vector<2x8x1xf32>
    %33 = arith.mulf %29, %32 : vector<2x8x1xf32>
    %34 = vector.broadcast %33 : vector<2x8x1xf32> to vector<2x8x8xf32>
    %35 = arith.mulf %26, %34 : vector<2x8x8xf32>
    %36 = vector.extract_strided_slice %17 {offsets = [0, 0, 0], sizes = [2, 8, 8], strides = [1, 1, 1]} : vector<2x8x32xf32> to vector<2x8x8xf32>
    "tpu.trace_start"() <{level = 10 : i32, message = "bqk,bkd->bqd"}> : () -> ()
    %cst_15 = arith.constant dense<0.000000e+00> : vector<2x8x8xf32>
    %37 = tpu.matmul %35, %36, %cst_15 {dimension_numbers = #tpu.dot_dimension_numbers<[2], [1], [1], [2], [0, 0, 0, 1, 1, 2], [0], [0]>} : vector<2x8x8xf32>, vector<2x8x8xf32>, vector<2x8x8xf32> -> vector<2x8x8xf32>
    "tpu.trace_stop"() : () -> ()
    %38 = vector.shape_cast %37 : vector<2x8x8xf32> to vector<16x8xf32>
    %c0_16 = arith.constant 0 : index
    %c32 = arith.constant 32 : index
    %c0_17 = arith.constant 0 : index
    %39 = vector.load %arg2[%c0_16, %c32, %c0_17] : memref<2x160x96xf32, #tpu.memory_space<vmem>>, vector<1x8x32xf32>
    %40 = vector.shape_cast %39 : vector<1x8x32xf32> to vector<8x32xf32>
    %cst_18 = arith.constant dense<0.000000e+00> : vector<16x32xf32>
    %41 = tpu.matmul %38, %40, %cst_18 {dimension_numbers = #tpu.dot_dimension_numbers<[1], [0], [0], [1], [0, 0, 1, 1], [], []>} : vector<16x8xf32>, vector<8x32xf32>, vector<16x32xf32> -> vector<16x32xf32>
    %42 = arith.addf %18, %41 : vector<16x32xf32>
    %43 = vector.extract_strided_slice %13 {offsets = [0, 0, 8], sizes = [2, 8, 8], strides = [1, 1, 1]} : vector<2x8x32xf32> to vector<2x8x8xf32>
    %44 = vector.extract_strided_slice %15 {offsets = [0, 0, 8], sizes = [2, 8, 8], strides = [1, 1, 1]} : vector<2x8x32xf32> to vector<2x8x8xf32>
    "tpu.trace_start"() <{level = 10 : i32, message = "bqd,bkd->bqk"}> : () -> ()
    %cst_19 = arith.constant dense<0.000000e+00> : vector<2x8x8xf32>
    %45 = tpu.matmul %43, %44, %cst_19 {dimension_numbers = #tpu.dot_dimension_numbers<[2], [2], [1], [1], [0, 0, 0, 1, 1, 1], [0], [0]>} : vector<2x8x8xf32>, vector<2x8x8xf32>, vector<2x8x8xf32> -> vector<2x8x8xf32>
    "tpu.trace_stop"() : () -> ()
    %cst_20 = arith.constant dense<0xFF800000> : vector<2x8xf32>
    %46 = vector.multi_reduction <maximumf>, %45, %cst_20 [2] : vector<2x8x8xf32> to vector<2x8xf32>
    %47 = vector.shape_cast %46 : vector<2x8xf32> to vector<2x8x1xf32>
    %48 = vector.broadcast %47 : vector<2x8x1xf32> to vector<2x8x8xf32>
    %49 = arith.subf %45, %48 : vector<2x8x8xf32>
    %50 = math.exp %49 : vector<2x8x8xf32>
    %cst_21 = arith.constant dense<0.000000e+00> : vector<2x8xf32>
    %51 = vector.multi_reduction <add>, %50, %cst_21 [2] : vector<2x8x8xf32> to vector<2x8xf32>
    %52 = vector.shape_cast %51 : vector<2x8xf32> to vector<2x8x1xf32>
    %53 = tpu.reciprocal %52 {approx = true} : vector<2x8x1xf32> -> vector<2x8x1xf32>
    %54 = arith.mulf %52, %53 : vector<2x8x1xf32>
    %cst_22 = arith.constant 2.000000e+00 : f32
    %55 = vector.broadcast %cst_22 : f32 to vector<2x8x1xf32>
    %56 = arith.subf %55, %54 : vector<2x8x1xf32>
    %57 = arith.mulf %53, %56 : vector<2x8x1xf32>
    %58 = vector.broadcast %57 : vector<2x8x1xf32> to vector<2x8x8xf32>
    %59 = arith.mulf %50, %58 : vector<2x8x8xf32>
    %60 = vector.extract_strided_slice %17 {offsets = [0, 0, 8], sizes = [2, 8, 8], strides = [1, 1, 1]} : vector<2x8x32xf32> to vector<2x8x8xf32>
    "tpu.trace_start"() <{level = 10 : i32, message = "bqk,bkd->bqd"}> : () -> ()
    %cst_23 = arith.constant dense<0.000000e+00> : vector<2x8x8xf32>
    %61 = tpu.matmul %59, %60, %cst_23 {dimension_numbers = #tpu.dot_dimension_numbers<[2], [1], [1], [2], [0, 0, 0, 1, 1, 2], [0], [0]>} : vector<2x8x8xf32>, vector<2x8x8xf32>, vector<2x8x8xf32> -> vector<2x8x8xf32>
    "tpu.trace_stop"() : () -> ()
    %62 = vector.shape_cast %61 : vector<2x8x8xf32> to vector<16x8xf32>
    %c0_24 = arith.constant 0 : index
    %c40 = arith.constant 40 : index
    %c0_25 = arith.constant 0 : index
    %63 = vector.load %arg2[%c0_24, %c40, %c0_25] : memref<2x160x96xf32, #tpu.memory_space<vmem>>, vector<1x8x32xf32>
    %64 = vector.shape_cast %63 : vector<1x8x32xf32> to vector<8x32xf32>
    %cst_26 = arith.constant dense<0.000000e+00> : vector<16x32xf32>
    %65 = tpu.matmul %62, %64, %cst_26 {dimension_numbers = #tpu.dot_dimension_numbers<[1], [0], [0], [1], [0, 0, 1, 1], [], []>} : vector<16x8xf32>, vector<8x32xf32>, vector<16x32xf32> -> vector<16x32xf32>
    %66 = arith.addf %42, %65 : vector<16x32xf32>
    %67 = vector.extract_strided_slice %13 {offsets = [0, 0, 16], sizes = [2, 8, 8], strides = [1, 1, 1]} : vector<2x8x32xf32> to vector<2x8x8xf32>
    %68 = vector.extract_strided_slice %15 {offsets = [0, 0, 16], sizes = [2, 8, 8], strides = [1, 1, 1]} : vector<2x8x32xf32> to vector<2x8x8xf32>
    "tpu.trace_start"() <{level = 10 : i32, message = "bqd,bkd->bqk"}> : () -> ()
    %cst_27 = arith.constant dense<0.000000e+00> : vector<2x8x8xf32>
    %69 = tpu.matmul %67, %68, %cst_27 {dimension_numbers = #tpu.dot_dimension_numbers<[2], [2], [1], [1], [0, 0, 0, 1, 1, 1], [0], [0]>} : vector<2x8x8xf32>, vector<2x8x8xf32>, vector<2x8x8xf32> -> vector<2x8x8xf32>
    "tpu.trace_stop"() : () -> ()
    %cst_28 = arith.constant dense<0xFF800000> : vector<2x8xf32>
    %70 = vector.multi_reduction <maximumf>, %69, %cst_28 [2] : vector<2x8x8xf32> to vector<2x8xf32>
    %71 = vector.shape_cast %70 : vector<2x8xf32> to vector<2x8x1xf32>
    %72 = vector.broadcast %71 : vector<2x8x1xf32> to vector<2x8x8xf32>
    %73 = arith.subf %69, %72 : vector<2x8x8xf32>
    %74 = math.exp %73 : vector<2x8x8xf32>
    %cst_29 = arith.constant dense<0.000000e+00> : vector<2x8xf32>
    %75 = vector.multi_reduction <add>, %74, %cst_29 [2] : vector<2x8x8xf32> to vector<2x8xf32>
    %76 = vector.shape_cast %75 : vector<2x8xf32> to vector<2x8x1xf32>
    %77 = tpu.reciprocal %76 {approx = true} : vector<2x8x1xf32> -> vector<2x8x1xf32>
    %78 = arith.mulf %76, %77 : vector<2x8x1xf32>
    %cst_30 = arith.constant 2.000000e+00 : f32
    %79 = vector.broadcast %cst_30 : f32 to vector<2x8x1xf32>
    %80 = arith.subf %79, %78 : vector<2x8x1xf32>
    %81 = arith.mulf %77, %80 : vector<2x8x1xf32>
    %82 = vector.broadcast %81 : vector<2x8x1xf32> to vector<2x8x8xf32>
    %83 = arith.mulf %74, %82 : vector<2x8x8xf32>
    %84 = vector.extract_strided_slice %17 {offsets = [0, 0, 16], sizes = [2, 8, 8], strides = [1, 1, 1]} : vector<2x8x32xf32> to vector<2x8x8xf32>
    "tpu.trace_start"() <{level = 10 : i32, message = "bqk,bkd->bqd"}> : () -> ()
    %cst_31 = arith.constant dense<0.000000e+00> : vector<2x8x8xf32>
    %85 = tpu.matmul %83, %84, %cst_31 {dimension_numbers = #tpu.dot_dimension_numbers<[2], [1], [1], [2], [0, 0, 0, 1, 1, 2], [0], [0]>} : vector<2x8x8xf32>, vector<2x8x8xf32>, vector<2x8x8xf32> -> vector<2x8x8xf32>
    "tpu.trace_stop"() : () -> ()
    %86 = vector.shape_cast %85 : vector<2x8x8xf32> to vector<16x8xf32>
    %c0_32 = arith.constant 0 : index
    %c48 = arith.constant 48 : index
    %c0_33 = arith.constant 0 : index
    %87 = vector.load %arg2[%c0_32, %c48, %c0_33] : memref<2x160x96xf32, #tpu.memory_space<vmem>>, vector<1x8x32xf32>
    %88 = vector.shape_cast %87 : vector<1x8x32xf32> to vector<8x32xf32>
    %cst_34 = arith.constant dense<0.000000e+00> : vector<16x32xf32>
    %89 = tpu.matmul %86, %88, %cst_34 {dimension_numbers = #tpu.dot_dimension_numbers<[1], [0], [0], [1], [0, 0, 1, 1], [], []>} : vector<16x8xf32>, vector<8x32xf32>, vector<16x32xf32> -> vector<16x32xf32>
    %90 = arith.addf %66, %89 : vector<16x32xf32>
    %91 = vector.extract_strided_slice %13 {offsets = [0, 0, 24], sizes = [2, 8, 8], strides = [1, 1, 1]} : vector<2x8x32xf32> to vector<2x8x8xf32>
    %92 = vector.extract_strided_slice %15 {offsets = [0, 0, 24], sizes = [2, 8, 8], strides = [1, 1, 1]} : vector<2x8x32xf32> to vector<2x8x8xf32>
    "tpu.trace_start"() <{level = 10 : i32, message = "bqd,bkd->bqk"}> : () -> ()
    %cst_35 = arith.constant dense<0.000000e+00> : vector<2x8x8xf32>
    %93 = tpu.matmul %91, %92, %cst_35 {dimension_numbers = #tpu.dot_dimension_numbers<[2], [2], [1], [1], [0, 0, 0, 1, 1, 1], [0], [0]>} : vector<2x8x8xf32>, vector<2x8x8xf32>, vector<2x8x8xf32> -> vector<2x8x8xf32>
    "tpu.trace_stop"() : () -> ()
    %cst_36 = arith.constant dense<0xFF800000> : vector<2x8xf32>
    %94 = vector.multi_reduction <maximumf>, %93, %cst_36 [2] : vector<2x8x8xf32> to vector<2x8xf32>
    %95 = vector.shape_cast %94 : vector<2x8xf32> to vector<2x8x1xf32>
    %96 = vector.broadcast %95 : vector<2x8x1xf32> to vector<2x8x8xf32>
    %97 = arith.subf %93, %96 : vector<2x8x8xf32>
    %98 = math.exp %97 : vector<2x8x8xf32>
    %cst_37 = arith.constant dense<0.000000e+00> : vector<2x8xf32>
    %99 = vector.multi_reduction <add>, %98, %cst_37 [2] : vector<2x8x8xf32> to vector<2x8xf32>
    %100 = vector.shape_cast %99 : vector<2x8xf32> to vector<2x8x1xf32>
    %101 = tpu.reciprocal %100 {approx = true} : vector<2x8x1xf32> -> vector<2x8x1xf32>
    %102 = arith.mulf %100, %101 : vector<2x8x1xf32>
    %cst_38 = arith.constant 2.000000e+00 : f32
    %103 = vector.broadcast %cst_38 : f32 to vector<2x8x1xf32>
    %104 = arith.subf %103, %102 : vector<2x8x1xf32>
    %105 = arith.mulf %101, %104 : vector<2x8x1xf32>
    %106 = vector.broadcast %105 : vector<2x8x1xf32> to vector<2x8x8xf32>
    %107 = arith.mulf %98, %106 : vector<2x8x8xf32>
    %108 = vector.extract_strided_slice %17 {offsets = [0, 0, 24], sizes = [2, 8, 8], strides = [1, 1, 1]} : vector<2x8x32xf32> to vector<2x8x8xf32>
    "tpu.trace_start"() <{level = 10 : i32, message = "bqk,bkd->bqd"}> : () -> ()
    %cst_39 = arith.constant dense<0.000000e+00> : vector<2x8x8xf32>
    %109 = tpu.matmul %107, %108, %cst_39 {dimension_numbers = #tpu.dot_dimension_numbers<[2], [1], [1], [2], [0, 0, 0, 1, 1, 2], [0], [0]>} : vector<2x8x8xf32>, vector<2x8x8xf32>, vector<2x8x8xf32> -> vector<2x8x8xf32>
    "tpu.trace_stop"() : () -> ()
    %110 = vector.shape_cast %109 : vector<2x8x8xf32> to vector<16x8xf32>
    %c0_40 = arith.constant 0 : index
    %c56 = arith.constant 56 : index
    %c0_41 = arith.constant 0 : index
    %111 = vector.load %arg2[%c0_40, %c56, %c0_41] : memref<2x160x96xf32, #tpu.memory_space<vmem>>, vector<1x8x32xf32>
    %112 = vector.shape_cast %111 : vector<1x8x32xf32> to vector<8x32xf32>
    %cst_42 = arith.constant dense<0.000000e+00> : vector<16x32xf32>
    %113 = tpu.matmul %110, %112, %cst_42 {dimension_numbers = #tpu.dot_dimension_numbers<[1], [0], [0], [1], [0, 0, 1, 1], [], []>} : vector<16x8xf32>, vector<8x32xf32>, vector<16x32xf32> -> vector<16x32xf32>
    %114 = arith.addf %90, %113 : vector<16x32xf32>
    %c0_43 = arith.constant 0 : index
    %c2 = arith.constant 2 : index
    %c0_44 = arith.constant 0 : index
    %115 = vector.load %arg3[%c0_43, %c2, %c0_44] : memref<2x16x96xf32, #tpu.memory_space<vmem>>, vector<1x1x32xf32>
    %116 = vector.shape_cast %115 : vector<1x1x32xf32> to vector<1x32xf32>
    %117 = vector.broadcast %116 : vector<1x32xf32> to vector<16x32xf32>
    %118 = arith.addf %114, %117 : vector<16x32xf32>
    %119 = arith.addf %4, %118 : vector<16x32xf32>
    %c0_45 = arith.constant 0 : index
    %c4 = arith.constant 4 : index
    %c0_46 = arith.constant 0 : index
    %120 = vector.load %arg3[%c0_45, %c4, %c0_46] : memref<2x16x96xf32, #tpu.memory_space<vmem>>, vector<1x1x32xf32>
    %121 = vector.shape_cast %120 : vector<1x1x32xf32> to vector<1x32xf32>
    %c0_47 = arith.constant 0 : index
    %c5 = arith.constant 5 : index
    %c0_48 = arith.constant 0 : index
    %122 = vector.load %arg3[%c0_47, %c5, %c0_48] : memref<2x16x96xf32, #tpu.memory_space<vmem>>, vector<1x1x32xf32>
    %123 = vector.shape_cast %122 : vector<1x1x32xf32> to vector<1x32xf32>
    %cst_49 = arith.constant dense<0.000000e+00> : vector<16xf32>
    %124 = vector.multi_reduction <add>, %119, %cst_49 [1] : vector<16x32xf32> to vector<16xf32>
    %125 = vector.shape_cast %124 : vector<16xf32> to vector<16x1xf32>
    %cst_50 = arith.constant 3.200000e+01 : f32
    %126 = vector.broadcast %cst_50 : f32 to vector<16x1xf32>
    %127 = arith.divf %125, %126 : vector<16x1xf32>
    %128 = vector.broadcast %127 : vector<16x1xf32> to vector<16x32xf32>
    %129 = arith.subf %119, %128 : vector<16x32xf32>
    %130 = arith.mulf %129, %129 : vector<16x32xf32>
    %cst_51 = arith.constant dense<0.000000e+00> : vector<16xf32>
    %131 = vector.multi_reduction <add>, %130, %cst_51 [1] : vector<16x32xf32> to vector<16xf32>
    %132 = vector.shape_cast %131 : vector<16xf32> to vector<16x1xf32>
    %cst_52 = arith.constant 3.200000e+01 : f32
    %133 = vector.broadcast %cst_52 : f32 to vector<16x1xf32>
    %134 = arith.divf %132, %133 : vector<16x1xf32>
    %cst_53 = arith.constant 9.99999974E-6 : f32
    %135 = vector.broadcast %cst_53 : f32 to vector<16x1xf32>
    %136 = arith.addf %134, %135 : vector<16x1xf32>
    %137 = math.rsqrt %136 : vector<16x1xf32>
    %138 = vector.broadcast %137 : vector<16x1xf32> to vector<16x32xf32>
    %139 = arith.mulf %129, %138 : vector<16x32xf32>
    %140 = vector.broadcast %121 : vector<1x32xf32> to vector<16x32xf32>
    %141 = arith.mulf %139, %140 : vector<16x32xf32>
    %142 = vector.broadcast %123 : vector<1x32xf32> to vector<16x32xf32>
    %143 = arith.addf %141, %142 : vector<16x32xf32>
    %c0_54 = arith.constant 0 : index
    %c64 = arith.constant 64 : index
    %c0_55 = arith.constant 0 : index
    %144 = vector.load %arg2[%c0_54, %c64, %c0_55] : memref<2x160x96xf32, #tpu.memory_space<vmem>>, vector<1x32x64xf32>
    %145 = vector.shape_cast %144 : vector<1x32x64xf32> to vector<32x64xf32>
    %cst_56 = arith.constant dense<0.000000e+00> : vector<16x64xf32>
    %146 = tpu.matmul %143, %145, %cst_56 {dimension_numbers = #tpu.dot_dimension_numbers<[1], [0], [0], [1], [0, 0, 1, 1], [], []>} : vector<16x32xf32>, vector<32x64xf32>, vector<16x64xf32> -> vector<16x64xf32>
    %c0_57 = arith.constant 0 : index
    %c1 = arith.constant 1 : index
    %c0_58 = arith.constant 0 : index
    %147 = vector.load %arg3[%c0_57, %c1, %c0_58] : memref<2x16x96xf32, #tpu.memory_space<vmem>>, vector<1x1x64xf32>
    %148 = vector.shape_cast %147 : vector<1x1x64xf32> to vector<1x64xf32>
    %149 = vector.broadcast %148 : vector<1x64xf32> to vector<16x64xf32>
    %150 = arith.addf %146, %149 : vector<16x64xf32>
    %cst_59 = arith.constant 0.000000e+00 : f32
    %151 = vector.broadcast %cst_59 : f32 to vector<16x64xf32>
    %152 = arith.maximumf %150, %151 : vector<16x64xf32>
    %c0_60 = arith.constant 0 : index
    %c96 = arith.constant 96 : index
    %c0_61 = arith.constant 0 : index
    %153 = vector.load %arg2[%c0_60, %c96, %c0_61] : memref<2x160x96xf32, #tpu.memory_space<vmem>>, vector<1x64x32xf32>
    %154 = vector.shape_cast %153 : vector<1x64x32xf32> to vector<64x32xf32>
    %cst_62 = arith.constant dense<0.000000e+00> : vector<16x32xf32>
    %155 = tpu.matmul %152, %154, %cst_62 {dimension_numbers = #tpu.dot_dimension_numbers<[1], [0], [0], [1], [0, 0, 1, 1], [], []>} : vector<16x64xf32>, vector<64x32xf32>, vector<16x32xf32> -> vector<16x32xf32>
    %c0_63 = arith.constant 0 : index
    %c3 = arith.constant 3 : index
    %c0_64 = arith.constant 0 : index
    %156 = vector.load %arg3[%c0_63, %c3, %c0_64] : memref<2x16x96xf32, #tpu.memory_space<vmem>>, vector<1x1x32xf32>
    %157 = vector.shape_cast %156 : vector<1x1x32xf32> to vector<1x32xf32>
    %158 = vector.broadcast %157 : vector<1x32xf32> to vector<16x32xf32>
    %159 = arith.addf %155, %158 : vector<16x32xf32>
    %160 = arith.addf %143, %159 : vector<16x32xf32>
    %c0_65 = arith.constant 0 : index
    %c6 = arith.constant 6 : index
    %c0_66 = arith.constant 0 : index
    %161 = vector.load %arg3[%c0_65, %c6, %c0_66] : memref<2x16x96xf32, #tpu.memory_space<vmem>>, vector<1x1x32xf32>
    %162 = vector.shape_cast %161 : vector<1x1x32xf32> to vector<1x32xf32>
    %c0_67 = arith.constant 0 : index
    %c7 = arith.constant 7 : index
    %c0_68 = arith.constant 0 : index
    %163 = vector.load %arg3[%c0_67, %c7, %c0_68] : memref<2x16x96xf32, #tpu.memory_space<vmem>>, vector<1x1x32xf32>
    %164 = vector.shape_cast %163 : vector<1x1x32xf32> to vector<1x32xf32>
    %cst_69 = arith.constant dense<0.000000e+00> : vector<16xf32>
    %165 = vector.multi_reduction <add>, %160, %cst_69 [1] : vector<16x32xf32> to vector<16xf32>
    %166 = vector.shape_cast %165 : vector<16xf32> to vector<16x1xf32>
    %cst_70 = arith.constant 3.200000e+01 : f32
    %167 = vector.broadcast %cst_70 : f32 to vector<16x1xf32>
    %168 = arith.divf %166, %167 : vector<16x1xf32>
    %169 = vector.broadcast %168 : vector<16x1xf32> to vector<16x32xf32>
    %170 = arith.subf %160, %169 : vector<16x32xf32>
    %171 = arith.mulf %170, %170 : vector<16x32xf32>
    %cst_71 = arith.constant dense<0.000000e+00> : vector<16xf32>
    %172 = vector.multi_reduction <add>, %171, %cst_71 [1] : vector<16x32xf32> to vector<16xf32>
    %173 = vector.shape_cast %172 : vector<16xf32> to vector<16x1xf32>
    %cst_72 = arith.constant 3.200000e+01 : f32
    %174 = vector.broadcast %cst_72 : f32 to vector<16x1xf32>
    %175 = arith.divf %173, %174 : vector<16x1xf32>
    %cst_73 = arith.constant 9.99999974E-6 : f32
    %176 = vector.broadcast %cst_73 : f32 to vector<16x1xf32>
    %177 = arith.addf %175, %176 : vector<16x1xf32>
    %178 = math.rsqrt %177 : vector<16x1xf32>
    %179 = vector.broadcast %178 : vector<16x1xf32> to vector<16x32xf32>
    %180 = arith.mulf %170, %179 : vector<16x32xf32>
    %181 = vector.broadcast %162 : vector<1x32xf32> to vector<16x32xf32>
    %182 = arith.mulf %180, %181 : vector<16x32xf32>
    %183 = vector.broadcast %164 : vector<1x32xf32> to vector<16x32xf32>
    %184 = arith.addf %182, %183 : vector<16x32xf32>
    %c1_74 = arith.constant 1 : index
    %c0_75 = arith.constant 0 : index
    %c0_76 = arith.constant 0 : index
    %185 = vector.load %arg2[%c1_74, %c0_75, %c0_76] : memref<2x160x96xf32, #tpu.memory_space<vmem>>, vector<1x32x96xf32>
    %186 = vector.shape_cast %185 : vector<1x32x96xf32> to vector<32x96xf32>
    %cst_77 = arith.constant dense<0.000000e+00> : vector<16x96xf32>
    %187 = tpu.matmul %184, %186, %cst_77 {dimension_numbers = #tpu.dot_dimension_numbers<[1], [0], [0], [1], [0, 0, 1, 1], [], []>} : vector<16x32xf32>, vector<32x96xf32>, vector<16x96xf32> -> vector<16x96xf32>
    %c1_78 = arith.constant 1 : index
    %c0_79 = arith.constant 0 : index
    %c0_80 = arith.constant 0 : index
    %188 = vector.load %arg3[%c1_78, %c0_79, %c0_80] : memref<2x16x96xf32, #tpu.memory_space<vmem>>, vector<1x1x96xf32>
    %189 = vector.shape_cast %188 : vector<1x1x96xf32> to vector<1x96xf32>
    %190 = vector.broadcast %189 : vector<1x96xf32> to vector<16x96xf32>
    %191 = arith.addf %187, %190 : vector<16x96xf32>
    %192 = vector.extract_strided_slice %191 {offsets = [0, 0], sizes = [16, 32], strides = [1, 1]} : vector<16x96xf32> to vector<16x32xf32>
    %193 = vector.shape_cast %192 : vector<16x32xf32> to vector<2x8x32xf32>
    %194 = vector.extract_strided_slice %191 {offsets = [0, 32], sizes = [16, 32], strides = [1, 1]} : vector<16x96xf32> to vector<16x32xf32>
    %195 = vector.shape_cast %194 : vector<16x32xf32> to vector<2x8x32xf32>
    %196 = vector.extract_strided_slice %191 {offsets = [0, 64], sizes = [16, 32], strides = [1, 1]} : vector<16x96xf32> to vector<16x32xf32>
    %197 = vector.shape_cast %196 : vector<16x32xf32> to vector<2x8x32xf32>
    %cst_81 = arith.constant 0.000000e+00 : f32
    %198 = vector.broadcast %cst_81 : f32 to vector<16x32xf32>
    %199 = vector.extract_strided_slice %193 {offsets = [0, 0, 0], sizes = [2, 8, 8], strides = [1, 1, 1]} : vector<2x8x32xf32> to vector<2x8x8xf32>
    %200 = vector.extract_strided_slice %195 {offsets = [0, 0, 0], sizes = [2, 8, 8], strides = [1, 1, 1]} : vector<2x8x32xf32> to vector<2x8x8xf32>
    "tpu.trace_start"() <{level = 10 : i32, message = "bqd,bkd->bqk"}> : () -> ()
    %cst_82 = arith.constant dense<0.000000e+00> : vector<2x8x8xf32>
    %201 = tpu.matmul %199, %200, %cst_82 {dimension_numbers = #tpu.dot_dimension_numbers<[2], [2], [1], [1], [0, 0, 0, 1, 1, 1], [0], [0]>} : vector<2x8x8xf32>, vector<2x8x8xf32>, vector<2x8x8xf32> -> vector<2x8x8xf32>
    "tpu.trace_stop"() : () -> ()
    %cst_83 = arith.constant dense<0xFF800000> : vector<2x8xf32>
    %202 = vector.multi_reduction <maximumf>, %201, %cst_83 [2] : vector<2x8x8xf32> to vector<2x8xf32>
    %203 = vector.shape_cast %202 : vector<2x8xf32> to vector<2x8x1xf32>
    %204 = vector.broadcast %203 : vector<2x8x1xf32> to vector<2x8x8xf32>
    %205 = arith.subf %201, %204 : vector<2x8x8xf32>
    %206 = math.exp %205 : vector<2x8x8xf32>
    %cst_84 = arith.constant dense<0.000000e+00> : vector<2x8xf32>
    %207 = vector.multi_reduction <add>, %206, %cst_84 [2] : vector<2x8x8xf32> to vector<2x8xf32>
    %208 = vector.shape_cast %207 : vector<2x8xf32> to vector<2x8x1xf32>
    %209 = tpu.reciprocal %208 {approx = true} : vector<2x8x1xf32> -> vector<2x8x1xf32>
    %210 = arith.mulf %208, %209 : vector<2x8x1xf32>
    %cst_85 = arith.constant 2.000000e+00 : f32
    %211 = vector.broadcast %cst_85 : f32 to vector<2x8x1xf32>
    %212 = arith.subf %211, %210 : vector<2x8x1xf32>
    %213 = arith.mulf %209, %212 : vector<2x8x1xf32>
    %214 = vector.broadcast %213 : vector<2x8x1xf32> to vector<2x8x8xf32>
    %215 = arith.mulf %206, %214 : vector<2x8x8xf32>
    %216 = vector.extract_strided_slice %197 {offsets = [0, 0, 0], sizes = [2, 8, 8], strides = [1, 1, 1]} : vector<2x8x32xf32> to vector<2x8x8xf32>
    "tpu.trace_start"() <{level = 10 : i32, message = "bqk,bkd->bqd"}> : () -> ()
    %cst_86 = arith.constant dense<0.000000e+00> : vector<2x8x8xf32>
    %217 = tpu.matmul %215, %216, %cst_86 {dimension_numbers = #tpu.dot_dimension_numbers<[2], [1], [1], [2], [0, 0, 0, 1, 1, 2], [0], [0]>} : vector<2x8x8xf32>, vector<2x8x8xf32>, vector<2x8x8xf32> -> vector<2x8x8xf32>
    "tpu.trace_stop"() : () -> ()
    %218 = vector.shape_cast %217 : vector<2x8x8xf32> to vector<16x8xf32>
    %c1_87 = arith.constant 1 : index
    %c32_88 = arith.constant 32 : index
    %c0_89 = arith.constant 0 : index
    %219 = vector.load %arg2[%c1_87, %c32_88, %c0_89] : memref<2x160x96xf32, #tpu.memory_space<vmem>>, vector<1x8x32xf32>
    %220 = vector.shape_cast %219 : vector<1x8x32xf32> to vector<8x32xf32>
    %cst_90 = arith.constant dense<0.000000e+00> : vector<16x32xf32>
    %221 = tpu.matmul %218, %220, %cst_90 {dimension_numbers = #tpu.dot_dimension_numbers<[1], [0], [0], [1], [0, 0, 1, 1], [], []>} : vector<16x8xf32>, vector<8x32xf32>, vector<16x32xf32> -> vector<16x32xf32>
    %222 = arith.addf %198, %221 : vector<16x32xf32>
    %223 = vector.extract_strided_slice %193 {offsets = [0, 0, 8], sizes = [2, 8, 8], strides = [1, 1, 1]} : vector<2x8x32xf32> to vector<2x8x8xf32>
    %224 = vector.extract_strided_slice %195 {offsets = [0, 0, 8], sizes = [2, 8, 8], strides = [1, 1, 1]} : vector<2x8x32xf32> to vector<2x8x8xf32>
    "tpu.trace_start"() <{level = 10 : i32, message = "bqd,bkd->bqk"}> : () -> ()
    %cst_91 = arith.constant dense<0.000000e+00> : vector<2x8x8xf32>
    %225 = tpu.matmul %223, %224, %cst_91 {dimension_numbers = #tpu.dot_dimension_numbers<[2], [2], [1], [1], [0, 0, 0, 1, 1, 1], [0], [0]>} : vector<2x8x8xf32>, vector<2x8x8xf32>, vector<2x8x8xf32> -> vector<2x8x8xf32>
    "tpu.trace_stop"() : () -> ()
    %cst_92 = arith.constant dense<0xFF800000> : vector<2x8xf32>
    %226 = vector.multi_reduction <maximumf>, %225, %cst_92 [2] : vector<2x8x8xf32> to vector<2x8xf32>
    %227 = vector.shape_cast %226 : vector<2x8xf32> to vector<2x8x1xf32>
    %228 = vector.broadcast %227 : vector<2x8x1xf32> to vector<2x8x8xf32>
    %229 = arith.subf %225, %228 : vector<2x8x8xf32>
    %230 = math.exp %229 : vector<2x8x8xf32>
    %cst_93 = arith.constant dense<0.000000e+00> : vector<2x8xf32>
    %231 = vector.multi_reduction <add>, %230, %cst_93 [2] : vector<2x8x8xf32> to vector<2x8xf32>
    %232 = vector.shape_cast %231 : vector<2x8xf32> to vector<2x8x1xf32>
    %233 = tpu.reciprocal %232 {approx = true} : vector<2x8x1xf32> -> vector<2x8x1xf32>
    %234 = arith.mulf %232, %233 : vector<2x8x1xf32>
    %cst_94 = arith.constant 2.000000e+00 : f32
    %235 = vector.broadcast %cst_94 : f32 to vector<2x8x1xf32>
    %236 = arith.subf %235, %234 : vector<2x8x1xf32>
    %237 = arith.mulf %233, %236 : vector<2x8x1xf32>
    %238 = vector.broadcast %237 : vector<2x8x1xf32> to vector<2x8x8xf32>
    %239 = arith.mulf %230, %238 : vector<2x8x8xf32>
    %240 = vector.extract_strided_slice %197 {offsets = [0, 0, 8], sizes = [2, 8, 8], strides = [1, 1, 1]} : vector<2x8x32xf32> to vector<2x8x8xf32>
    "tpu.trace_start"() <{level = 10 : i32, message = "bqk,bkd->bqd"}> : () -> ()
    %cst_95 = arith.constant dense<0.000000e+00> : vector<2x8x8xf32>
    %241 = tpu.matmul %239, %240, %cst_95 {dimension_numbers = #tpu.dot_dimension_numbers<[2], [1], [1], [2], [0, 0, 0, 1, 1, 2], [0], [0]>} : vector<2x8x8xf32>, vector<2x8x8xf32>, vector<2x8x8xf32> -> vector<2x8x8xf32>
    "tpu.trace_stop"() : () -> ()
    %242 = vector.shape_cast %241 : vector<2x8x8xf32> to vector<16x8xf32>
    %c1_96 = arith.constant 1 : index
    %c40_97 = arith.constant 40 : index
    %c0_98 = arith.constant 0 : index
    %243 = vector.load %arg2[%c1_96, %c40_97, %c0_98] : memref<2x160x96xf32, #tpu.memory_space<vmem>>, vector<1x8x32xf32>
    %244 = vector.shape_cast %243 : vector<1x8x32xf32> to vector<8x32xf32>
    %cst_99 = arith.constant dense<0.000000e+00> : vector<16x32xf32>
    %245 = tpu.matmul %242, %244, %cst_99 {dimension_numbers = #tpu.dot_dimension_numbers<[1], [0], [0], [1], [0, 0, 1, 1], [], []>} : vector<16x8xf32>, vector<8x32xf32>, vector<16x32xf32> -> vector<16x32xf32>
    %246 = arith.addf %222, %245 : vector<16x32xf32>
    %247 = vector.extract_strided_slice %193 {offsets = [0, 0, 16], sizes = [2, 8, 8], strides = [1, 1, 1]} : vector<2x8x32xf32> to vector<2x8x8xf32>
    %248 = vector.extract_strided_slice %195 {offsets = [0, 0, 16], sizes = [2, 8, 8], strides = [1, 1, 1]} : vector<2x8x32xf32> to vector<2x8x8xf32>
    "tpu.trace_start"() <{level = 10 : i32, message = "bqd,bkd->bqk"}> : () -> ()
    %cst_100 = arith.constant dense<0.000000e+00> : vector<2x8x8xf32>
    %249 = tpu.matmul %247, %248, %cst_100 {dimension_numbers = #tpu.dot_dimension_numbers<[2], [2], [1], [1], [0, 0, 0, 1, 1, 1], [0], [0]>} : vector<2x8x8xf32>, vector<2x8x8xf32>, vector<2x8x8xf32> -> vector<2x8x8xf32>
    "tpu.trace_stop"() : () -> ()
    %cst_101 = arith.constant dense<0xFF800000> : vector<2x8xf32>
    %250 = vector.multi_reduction <maximumf>, %249, %cst_101 [2] : vector<2x8x8xf32> to vector<2x8xf32>
    %251 = vector.shape_cast %250 : vector<2x8xf32> to vector<2x8x1xf32>
    %252 = vector.broadcast %251 : vector<2x8x1xf32> to vector<2x8x8xf32>
    %253 = arith.subf %249, %252 : vector<2x8x8xf32>
    %254 = math.exp %253 : vector<2x8x8xf32>
    %cst_102 = arith.constant dense<0.000000e+00> : vector<2x8xf32>
    %255 = vector.multi_reduction <add>, %254, %cst_102 [2] : vector<2x8x8xf32> to vector<2x8xf32>
    %256 = vector.shape_cast %255 : vector<2x8xf32> to vector<2x8x1xf32>
    %257 = tpu.reciprocal %256 {approx = true} : vector<2x8x1xf32> -> vector<2x8x1xf32>
    %258 = arith.mulf %256, %257 : vector<2x8x1xf32>
    %cst_103 = arith.constant 2.000000e+00 : f32
    %259 = vector.broadcast %cst_103 : f32 to vector<2x8x1xf32>
    %260 = arith.subf %259, %258 : vector<2x8x1xf32>
    %261 = arith.mulf %257, %260 : vector<2x8x1xf32>
    %262 = vector.broadcast %261 : vector<2x8x1xf32> to vector<2x8x8xf32>
    %263 = arith.mulf %254, %262 : vector<2x8x8xf32>
    %264 = vector.extract_strided_slice %197 {offsets = [0, 0, 16], sizes = [2, 8, 8], strides = [1, 1, 1]} : vector<2x8x32xf32> to vector<2x8x8xf32>
    "tpu.trace_start"() <{level = 10 : i32, message = "bqk,bkd->bqd"}> : () -> ()
    %cst_104 = arith.constant dense<0.000000e+00> : vector<2x8x8xf32>
    %265 = tpu.matmul %263, %264, %cst_104 {dimension_numbers = #tpu.dot_dimension_numbers<[2], [1], [1], [2], [0, 0, 0, 1, 1, 2], [0], [0]>} : vector<2x8x8xf32>, vector<2x8x8xf32>, vector<2x8x8xf32> -> vector<2x8x8xf32>
    "tpu.trace_stop"() : () -> ()
    %266 = vector.shape_cast %265 : vector<2x8x8xf32> to vector<16x8xf32>
    %c1_105 = arith.constant 1 : index
    %c48_106 = arith.constant 48 : index
    %c0_107 = arith.constant 0 : index
    %267 = vector.load %arg2[%c1_105, %c48_106, %c0_107] : memref<2x160x96xf32, #tpu.memory_space<vmem>>, vector<1x8x32xf32>
    %268 = vector.shape_cast %267 : vector<1x8x32xf32> to vector<8x32xf32>
    %cst_108 = arith.constant dense<0.000000e+00> : vector<16x32xf32>
    %269 = tpu.matmul %266, %268, %cst_108 {dimension_numbers = #tpu.dot_dimension_numbers<[1], [0], [0], [1], [0, 0, 1, 1], [], []>} : vector<16x8xf32>, vector<8x32xf32>, vector<16x32xf32> -> vector<16x32xf32>
    %270 = arith.addf %246, %269 : vector<16x32xf32>
    %271 = vector.extract_strided_slice %193 {offsets = [0, 0, 24], sizes = [2, 8, 8], strides = [1, 1, 1]} : vector<2x8x32xf32> to vector<2x8x8xf32>
    %272 = vector.extract_strided_slice %195 {offsets = [0, 0, 24], sizes = [2, 8, 8], strides = [1, 1, 1]} : vector<2x8x32xf32> to vector<2x8x8xf32>
    "tpu.trace_start"() <{level = 10 : i32, message = "bqd,bkd->bqk"}> : () -> ()
    %cst_109 = arith.constant dense<0.000000e+00> : vector<2x8x8xf32>
    %273 = tpu.matmul %271, %272, %cst_109 {dimension_numbers = #tpu.dot_dimension_numbers<[2], [2], [1], [1], [0, 0, 0, 1, 1, 1], [0], [0]>} : vector<2x8x8xf32>, vector<2x8x8xf32>, vector<2x8x8xf32> -> vector<2x8x8xf32>
    "tpu.trace_stop"() : () -> ()
    %cst_110 = arith.constant dense<0xFF800000> : vector<2x8xf32>
    %274 = vector.multi_reduction <maximumf>, %273, %cst_110 [2] : vector<2x8x8xf32> to vector<2x8xf32>
    %275 = vector.shape_cast %274 : vector<2x8xf32> to vector<2x8x1xf32>
    %276 = vector.broadcast %275 : vector<2x8x1xf32> to vector<2x8x8xf32>
    %277 = arith.subf %273, %276 : vector<2x8x8xf32>
    %278 = math.exp %277 : vector<2x8x8xf32>
    %cst_111 = arith.constant dense<0.000000e+00> : vector<2x8xf32>
    %279 = vector.multi_reduction <add>, %278, %cst_111 [2] : vector<2x8x8xf32> to vector<2x8xf32>
    %280 = vector.shape_cast %279 : vector<2x8xf32> to vector<2x8x1xf32>
    %281 = tpu.reciprocal %280 {approx = true} : vector<2x8x1xf32> -> vector<2x8x1xf32>
    %282 = arith.mulf %280, %281 : vector<2x8x1xf32>
    %cst_112 = arith.constant 2.000000e+00 : f32
    %283 = vector.broadcast %cst_112 : f32 to vector<2x8x1xf32>
    %284 = arith.subf %283, %282 : vector<2x8x1xf32>
    %285 = arith.mulf %281, %284 : vector<2x8x1xf32>
    %286 = vector.broadcast %285 : vector<2x8x1xf32> to vector<2x8x8xf32>
    %287 = arith.mulf %278, %286 : vector<2x8x8xf32>
    %288 = vector.extract_strided_slice %197 {offsets = [0, 0, 24], sizes = [2, 8, 8], strides = [1, 1, 1]} : vector<2x8x32xf32> to vector<2x8x8xf32>
    "tpu.trace_start"() <{level = 10 : i32, message = "bqk,bkd->bqd"}> : () -> ()
    %cst_113 = arith.constant dense<0.000000e+00> : vector<2x8x8xf32>
    %289 = tpu.matmul %287, %288, %cst_113 {dimension_numbers = #tpu.dot_dimension_numbers<[2], [1], [1], [2], [0, 0, 0, 1, 1, 2], [0], [0]>} : vector<2x8x8xf32>, vector<2x8x8xf32>, vector<2x8x8xf32> -> vector<2x8x8xf32>
    "tpu.trace_stop"() : () -> ()
    %290 = vector.shape_cast %289 : vector<2x8x8xf32> to vector<16x8xf32>
    %c1_114 = arith.constant 1 : index
    %c56_115 = arith.constant 56 : index
    %c0_116 = arith.constant 0 : index
    %291 = vector.load %arg2[%c1_114, %c56_115, %c0_116] : memref<2x160x96xf32, #tpu.memory_space<vmem>>, vector<1x8x32xf32>
    %292 = vector.shape_cast %291 : vector<1x8x32xf32> to vector<8x32xf32>
    %cst_117 = arith.constant dense<0.000000e+00> : vector<16x32xf32>
    %293 = tpu.matmul %290, %292, %cst_117 {dimension_numbers = #tpu.dot_dimension_numbers<[1], [0], [0], [1], [0, 0, 1, 1], [], []>} : vector<16x8xf32>, vector<8x32xf32>, vector<16x32xf32> -> vector<16x32xf32>
    %294 = arith.addf %270, %293 : vector<16x32xf32>
    %c1_118 = arith.constant 1 : index
    %c2_119 = arith.constant 2 : index
    %c0_120 = arith.constant 0 : index
    %295 = vector.load %arg3[%c1_118, %c2_119, %c0_120] : memref<2x16x96xf32, #tpu.memory_space<vmem>>, vector<1x1x32xf32>
    %296 = vector.shape_cast %295 : vector<1x1x32xf32> to vector<1x32xf32>
    %297 = vector.broadcast %296 : vector<1x32xf32> to vector<16x32xf32>
    %298 = arith.addf %294, %297 : vector<16x32xf32>
    %299 = arith.addf %184, %298 : vector<16x32xf32>
    %c1_121 = arith.constant 1 : index
    %c4_122 = arith.constant 4 : index
    %c0_123 = arith.constant 0 : index
    %300 = vector.load %arg3[%c1_121, %c4_122, %c0_123] : memref<2x16x96xf32, #tpu.memory_space<vmem>>, vector<1x1x32xf32>
    %301 = vector.shape_cast %300 : vector<1x1x32xf32> to vector<1x32xf32>
    %c1_124 = arith.constant 1 : index
    %c5_125 = arith.constant 5 : index
    %c0_126 = arith.constant 0 : index
    %302 = vector.load %arg3[%c1_124, %c5_125, %c0_126] : memref<2x16x96xf32, #tpu.memory_space<vmem>>, vector<1x1x32xf32>
    %303 = vector.shape_cast %302 : vector<1x1x32xf32> to vector<1x32xf32>
    %cst_127 = arith.constant dense<0.000000e+00> : vector<16xf32>
    %304 = vector.multi_reduction <add>, %299, %cst_127 [1] : vector<16x32xf32> to vector<16xf32>
    %305 = vector.shape_cast %304 : vector<16xf32> to vector<16x1xf32>
    %cst_128 = arith.constant 3.200000e+01 : f32
    %306 = vector.broadcast %cst_128 : f32 to vector<16x1xf32>
    %307 = arith.divf %305, %306 : vector<16x1xf32>
    %308 = vector.broadcast %307 : vector<16x1xf32> to vector<16x32xf32>
    %309 = arith.subf %299, %308 : vector<16x32xf32>
    %310 = arith.mulf %309, %309 : vector<16x32xf32>
    %cst_129 = arith.constant dense<0.000000e+00> : vector<16xf32>
    %311 = vector.multi_reduction <add>, %310, %cst_129 [1] : vector<16x32xf32> to vector<16xf32>
    %312 = vector.shape_cast %311 : vector<16xf32> to vector<16x1xf32>
    %cst_130 = arith.constant 3.200000e+01 : f32
    %313 = vector.broadcast %cst_130 : f32 to vector<16x1xf32>
    %314 = arith.divf %312, %313 : vector<16x1xf32>
    %cst_131 = arith.constant 9.99999974E-6 : f32
    %315 = vector.broadcast %cst_131 : f32 to vector<16x1xf32>
    %316 = arith.addf %314, %315 : vector<16x1xf32>
    %317 = math.rsqrt %316 : vector<16x1xf32>
    %318 = vector.broadcast %317 : vector<16x1xf32> to vector<16x32xf32>
    %319 = arith.mulf %309, %318 : vector<16x32xf32>
    %320 = vector.broadcast %301 : vector<1x32xf32> to vector<16x32xf32>
    %321 = arith.mulf %319, %320 : vector<16x32xf32>
    %322 = vector.broadcast %303 : vector<1x32xf32> to vector<16x32xf32>
    %323 = arith.addf %321, %322 : vector<16x32xf32>
    %324 = vector.shape_cast %323 : vector<16x32xf32> to vector<2x8x32xf32>
    %325 = vector.extract_strided_slice %324 {offsets = [0, 7, 0], sizes = [2, 1, 32], strides = [1, 1, 1]} : vector<2x8x32xf32> to vector<2x1x32xf32>
    %326 = vector.shape_cast %325 : vector<2x1x32xf32> to vector<2x32xf32>
    %c1_132 = arith.constant 1 : index
    %c64_133 = arith.constant 64 : index
    %c0_134 = arith.constant 0 : index
    %327 = vector.load %arg2[%c1_132, %c64_133, %c0_134] : memref<2x160x96xf32, #tpu.memory_space<vmem>>, vector<1x32x64xf32>
    %328 = vector.shape_cast %327 : vector<1x32x64xf32> to vector<32x64xf32>
    %cst_135 = arith.constant dense<0.000000e+00> : vector<2x64xf32>
    %329 = tpu.matmul %326, %328, %cst_135 {dimension_numbers = #tpu.dot_dimension_numbers<[1], [0], [0], [1], [0, 0, 1, 1], [], []>} : vector<2x32xf32>, vector<32x64xf32>, vector<2x64xf32> -> vector<2x64xf32>
    %c1_136 = arith.constant 1 : index
    %c1_137 = arith.constant 1 : index
    %c0_138 = arith.constant 0 : index
    %330 = vector.load %arg3[%c1_136, %c1_137, %c0_138] : memref<2x16x96xf32, #tpu.memory_space<vmem>>, vector<1x1x64xf32>
    %331 = vector.shape_cast %330 : vector<1x1x64xf32> to vector<1x64xf32>
    %332 = vector.broadcast %331 : vector<1x64xf32> to vector<2x64xf32>
    %333 = arith.addf %329, %332 : vector<2x64xf32>
    %cst_139 = arith.constant 0.000000e+00 : f32
    %334 = vector.broadcast %cst_139 : f32 to vector<2x64xf32>
    %335 = arith.maximumf %333, %334 : vector<2x64xf32>
    %c1_140 = arith.constant 1 : index
    %c96_141 = arith.constant 96 : index
    %c0_142 = arith.constant 0 : index
    %336 = vector.load %arg2[%c1_140, %c96_141, %c0_142] : memref<2x160x96xf32, #tpu.memory_space<vmem>>, vector<1x64x32xf32>
    %337 = vector.shape_cast %336 : vector<1x64x32xf32> to vector<64x32xf32>
    %cst_143 = arith.constant dense<0.000000e+00> : vector<2x32xf32>
    %338 = tpu.matmul %335, %337, %cst_143 {dimension_numbers = #tpu.dot_dimension_numbers<[1], [0], [0], [1], [0, 0, 1, 1], [], []>} : vector<2x64xf32>, vector<64x32xf32>, vector<2x32xf32> -> vector<2x32xf32>
    %c1_144 = arith.constant 1 : index
    %c3_145 = arith.constant 3 : index
    %c0_146 = arith.constant 0 : index
    %339 = vector.load %arg3[%c1_144, %c3_145, %c0_146] : memref<2x16x96xf32, #tpu.memory_space<vmem>>, vector<1x1x32xf32>
    %340 = vector.shape_cast %339 : vector<1x1x32xf32> to vector<1x32xf32>
    %341 = vector.broadcast %340 : vector<1x32xf32> to vector<2x32xf32>
    %342 = arith.addf %338, %341 : vector<2x32xf32>
    %343 = arith.addf %326, %342 : vector<2x32xf32>
    %c1_147 = arith.constant 1 : index
    %c6_148 = arith.constant 6 : index
    %c0_149 = arith.constant 0 : index
    %344 = vector.load %arg3[%c1_147, %c6_148, %c0_149] : memref<2x16x96xf32, #tpu.memory_space<vmem>>, vector<1x1x32xf32>
    %345 = vector.shape_cast %344 : vector<1x1x32xf32> to vector<1x32xf32>
    %c1_150 = arith.constant 1 : index
    %c7_151 = arith.constant 7 : index
    %c0_152 = arith.constant 0 : index
    %346 = vector.load %arg3[%c1_150, %c7_151, %c0_152] : memref<2x16x96xf32, #tpu.memory_space<vmem>>, vector<1x1x32xf32>
    %347 = vector.shape_cast %346 : vector<1x1x32xf32> to vector<1x32xf32>
    %cst_153 = arith.constant dense<0.000000e+00> : vector<2xf32>
    %348 = vector.multi_reduction <add>, %343, %cst_153 [1] : vector<2x32xf32> to vector<2xf32>
    %349 = vector.shape_cast %348 : vector<2xf32> to vector<2x1xf32>
    %cst_154 = arith.constant 3.200000e+01 : f32
    %350 = vector.broadcast %cst_154 : f32 to vector<2x1xf32>
    %351 = arith.divf %349, %350 : vector<2x1xf32>
    %352 = vector.broadcast %351 : vector<2x1xf32> to vector<2x32xf32>
    %353 = arith.subf %343, %352 : vector<2x32xf32>
    %354 = arith.mulf %353, %353 : vector<2x32xf32>
    %cst_155 = arith.constant dense<0.000000e+00> : vector<2xf32>
    %355 = vector.multi_reduction <add>, %354, %cst_155 [1] : vector<2x32xf32> to vector<2xf32>
    %356 = vector.shape_cast %355 : vector<2xf32> to vector<2x1xf32>
    %cst_156 = arith.constant 3.200000e+01 : f32
    %357 = vector.broadcast %cst_156 : f32 to vector<2x1xf32>
    %358 = arith.divf %356, %357 : vector<2x1xf32>
    %cst_157 = arith.constant 9.99999974E-6 : f32
    %359 = vector.broadcast %cst_157 : f32 to vector<2x1xf32>
    %360 = arith.addf %358, %359 : vector<2x1xf32>
    %361 = math.rsqrt %360 : vector<2x1xf32>
    %362 = vector.broadcast %361 : vector<2x1xf32> to vector<2x32xf32>
    %363 = arith.mulf %353, %362 : vector<2x32xf32>
    %364 = vector.broadcast %345 : vector<1x32xf32> to vector<2x32xf32>
    %365 = arith.mulf %363, %364 : vector<2x32xf32>
    %366 = vector.broadcast %347 : vector<1x32xf32> to vector<2x32xf32>
    %367 = arith.addf %365, %366 : vector<2x32xf32>
    %c1_158 = arith.constant 1 : index
    %c8 = arith.constant 8 : index
    %c0_159 = arith.constant 0 : index
    %368 = vector.load %arg3[%c1_158, %c8, %c0_159] : memref<2x16x96xf32, #tpu.memory_space<vmem>>, vector<1x1x32xf32>
    %369 = vector.shape_cast %368 : vector<1x1x32xf32> to vector<1x32xf32>
    %c1_160 = arith.constant 1 : index
    %c9 = arith.constant 9 : index
    %c0_161 = arith.constant 0 : index
    %370 = vector.load %arg3[%c1_160, %c9, %c0_161] : memref<2x16x96xf32, #tpu.memory_space<vmem>>, vector<1x1x1xf32>
    %371 = vector.shape_cast %370 : vector<1x1x1xf32> to vector<1x1xf32>
    %372 = vector.broadcast %369 : vector<1x32xf32> to vector<2x32xf32>
    %373 = arith.mulf %367, %372 : vector<2x32xf32>
    %cst_162 = arith.constant dense<0.000000e+00> : vector<2xf32>
    %374 = vector.multi_reduction <add>, %373, %cst_162 [1] : vector<2x32xf32> to vector<2xf32>
    %375 = vector.shape_cast %374 : vector<2xf32> to vector<2x1xf32>
    %376 = vector.broadcast %371 : vector<1x1xf32> to vector<2x1xf32>
    %377 = arith.addf %375, %376 : vector<2x1xf32>
    %c0_163 = arith.constant 0 : index
    %c0_164 = arith.constant 0 : index
    %378 = vector.load %arg4[%c0_163, %c0_164] : memref<2x1xf32, #tpu.memory_space<vmem>>, vector<2x1xf32>
    tpu.vector_store %arg4[%c0_163, %c0_164], %377 {strides = array<i32>} : memref<2x1xf32, #tpu.memory_space<vmem>>, vector<2x1xf32>,
    return
  }
}

</mosaic_0001>

<bundles_post_ra>
// kernel: tpu_custom_call.1
= control target key start
LH: loop header
LB: loop body
LE: loop exit
PB: predicated region body
PF: predicated region fallthrough
CT: control target
= control target key end

     0   :  { %9 = vsyncpa [#allocation3], 0  ;;  %s5464_s0 = inlined_call_operand.hbm [shape: f32[16,32], index: 0, kind: input, shape index: {}]   ;;  %s5465_s1 = inlined_call_operand.hbm [shape: f32[16,32], index: 1, kind: input, shape index: {}]   ;;  %s5466_s2 = inlined_call_operand.hbm [shape: f32[2,160,96], index: 2, kind: input, shape index: {}]   ;;  %s5467_s3 = inlined_call_operand.hbm [shape: f32[2,16,96], index: 3, kind: input, shape index: {}]   ;;  %s5468_s4 = inlined_call_operand.vmem [shape: f32[2,1], index: 4, kind: output, shape index: {}]  }
   0x1   :  { %10 = vsyncpa [#allocation5], 0 }
   0x2   :  { %11 = vsyncpa [#allocation8], 0  ;;  %s4987_s15 = smov [#allocation4]   ;;  %s4988_s17 = smov [#allocation2]  }
   0x3   :  { %s29_s16 = sshll.u32 %s4987_s15, 4  ;;  %s17_s18 = sshll.u32 %s4988_s17, 4  ;;  %s30_s16 = int_to_ptr.vmem [resolvable:$true] %s29_s16  ;;  %s5032_s18 = int_to_ptr.vmem [resolvable:$true] %s17_s18 }
   0x4   :  { %s4893_s21 = scalar_lea.hbm %s5465_s1, 256 }
   0x5   :  { %p4894_p0 = scmp.ne.s32.totalorder %s5465_s1, %s4893_s21  ;;  %p4897_p1 = scmp.lt.u32.totalorder %s4893_s21, %s5465_s1 }
   0x7   :  { %p4899_p2 = pnand %p4897_p1, %p4894_p0 }
   0x9   :  { %4902 = shalt.err (!%p4899_p2)
}
   0xa   :  { %s4903_s26 = scalar_lea.vmem %s30_s16, 256  ;;  %p4908_p4 = scmp.lt.s32.totalorder %s30_s16, %s30_s16 }
   0xb   :  { %p4904_p3 = scmp.ne.s32.totalorder %s30_s16, %s4903_s26  ;;  %p4909_p5 = scmp.lt.s32.totalorder %s4903_s26, %s4903_s26 }
   0xd   :  { %p4910_p6 = por %p4909_p5, %p4908_p4 }
   0xf   :  { %p4911_p7 = pnand %p4910_p6, %p4904_p3 }
  0x11   :  { %4914 = shalt.err (!%p4911_p7)
}
  0x12   :  { %s4989_s27 = smov 128   ;;  %s4990_s28 = smov 8  }
  0x13   :  { %35 = dma.hbm_to_vmem [thread:$0]  %s5465_s1, 256, %s30_s16, [#allocation5], %s4989_s27, %s4989_s27, %s4990_s28  }
  0x14   :  { %s4915_s7 = scalar_lea.hbm %s5464_s0, 256 }
  0x15   :  { %p4916_p8 = scmp.ne.s32.totalorder %s5464_s0, %s4915_s7  ;;  %p4919_p9 = scmp.lt.u32.totalorder %s4915_s7, %s5464_s0 }
  0x17   :  { %p4921_p10 = pnand %p4919_p9, %p4916_p8 }
  0x19   :  { %4924 = shalt.err (!%p4921_p10)
}
  0x1a   :  { %s4925_s12 = scalar_lea.vmem %s5032_s18, 256  ;;  %p4930_p12 = scmp.lt.s32.totalorder %s5032_s18, %s5032_s18 }
  0x1b   :  { %p4926_p11 = scmp.ne.s32.totalorder %s5032_s18, %s4925_s12  ;;  %p4931_p13 = scmp.lt.s32.totalorder %s4925_s12, %s4925_s12 }
  0x1d   :  { %p4932_p0 = por %p4931_p13, %p4930_p12 }
  0x1f   :  { %p4933_p1 = pnand %p4932_p0, %p4926_p11 }
  0x21   :  { %4936 = shalt.err (!%p4933_p1)
}
  0x22   :  { %23 = dma.hbm_to_vmem [thread:$0]  %s5464_s0, 256, %s5032_s18, [#allocation3], %s4989_s27, %s4989_s27, %s4990_s28  }
  0x23   :  { %s4991_s14 = smov [#allocation6]   ;;  %s4992_s16 = smov [#allocation7]  }
  0x24   :  { %s41_s15 = sshll.u32 %s4991_s14, 4  ;;  %s53_s17 = sshll.u32 %s4992_s16, 4  ;;  %s42_s15 = int_to_ptr.vmem [resolvable:$true] %s41_s15  ;;  %s5069_s17 = int_to_ptr.vmem [resolvable:$true] %s53_s17 }
  0x25   :  { %s4937_s21 = scalar_lea.hbm %s5466_s2, 5120 }
  0x26   :  { %p4938_p2 = scmp.ne.s32.totalorder %s5466_s2, %s4937_s21  ;;  %p4941_p3 = scmp.lt.u32.totalorder %s4937_s21, %s5466_s2 }
  0x28   :  { %p4943_p4 = pnand %p4941_p3, %p4938_p2 }
  0x2a   :  { %4946 = shalt.err (!%p4943_p4)
}
  0x2b   :  { %s4947_s0 = scalar_lea.vmem %s42_s15, 5120  ;;  %p4952_p6 = scmp.lt.s32.totalorder %s42_s15, %s42_s15 }
  0x2c   :  { %p4948_p5 = scmp.ne.s32.totalorder %s42_s15, %s4947_s0  ;;  %p4953_p7 = scmp.lt.s32.totalorder %s4947_s0, %s4947_s0 }
  0x2e   :  { %p4954_p8 = por %p4953_p7, %p4952_p6 }
  0x30   :  { %p4955_p9 = pnand %p4954_p8, %p4948_p5 }
  0x32   :  { %4958 = shalt.err (!%p4955_p9)
}
  0x33   :  { %47 = dma.hbm_to_vmem [thread:$0]  %s5466_s2, 5120, %s42_s15, [#allocation5], %s4989_s27, %s4989_s27, %s4990_s28  }
  0x34   :  { %s4959_s5 = scalar_lea.hbm %s5467_s3, 512 }
  0x35   :  { %p4960_p10 = scmp.ne.s32.totalorder %s5467_s3, %s4959_s5  ;;  %p4963_p11 = scmp.lt.u32.totalorder %s4959_s5, %s5467_s3 }
  0x37   :  { %p4965_p12 = pnand %p4963_p11, %p4960_p10 }
  0x39   :  { %4968 = shalt.err (!%p4965_p12)
}
  0x3a   :  { %s4969_s10 = scalar_lea.vmem %s5069_s17, 512  ;;  %p4974_p0 = scmp.lt.s32.totalorder %s5069_s17, %s5069_s17 }
  0x3b   :  { %p4970_p13 = scmp.ne.s32.totalorder %s5069_s17, %s4969_s10  ;;  %p4975_p1 = scmp.lt.s32.totalorder %s4969_s10, %s4969_s10 }
  0x3d   :  { %p4976_p2 = por %p4975_p1, %p4974_p0 }
  0x3f   :  { %p4977_p3 = pnand %p4976_p2, %p4970_p13 }
  0x41   :  { %4980 = shalt.err (!%p4977_p3)
}
  0x42   :  { %59 = dma.hbm_to_vmem [thread:$0]  %s5467_s3, 512, %s5069_s17, [#allocation8], %s4989_s27, %s4989_s27, %s4990_s28  }
  0x43   :  { %4981 = dma.done.wait [#allocation3], 256  }
  0x44   :  { %4982 = vsyncadd [#allocation3], 4294967040 }
  0x45   :  { %4983 = dma.done.wait [#allocation5], 5376  }
  0x46   :  { %4984 = vsyncadd [#allocation5], 4294961920 }
  0x47   :  { %4985 = dma.done.wait [#allocation8], 512  }
  0x48   :  { %4986 = vsyncadd [#allocation8], 4294966784  ;;  %v80_v0 = vld [vmem:[#allocation6] sm:$0xff]  ;;  %v81_v1 = vld [vmem:[#allocation6 + $0x8] sm:$0xff]  ;;  %vm89_vm0 = vcmask 261120   ;;  %v4993_v14 = vmov 0.0  }
  0x49   :  { %v82_v2 = vld [vmem:[#allocation6 + $0x10] sm:$0xff]  ;;  %v4723_v3 = vpack.c.bf16 %v81_v1, %v80_v0  ;;  %v83_v4 = vld [vmem:[#allocation6 + $0x18] sm:$0xff]  ;;  %v72_v5 = vld [vmem:[#allocation2] sm:$0xff]  ;;  %4462 = vmatprep.subr.mxu0 %v4993_v14  ;;  %vm4994_vm1 = vmmov 0   ;;  %s4995_s3 = smov 96   ;;  %s4996_s27 = smov 64  }
  0x4a   :  { %v76_v6 = vld [vmem:[#allocation4] sm:$0xff]  ;;  %v4727_v7 = vpack.c.bf16 %v83_v4, %v82_v2  ;;  %v74_v8 = vmul.f32 5.656854, %v72_v5  ;;  %v73_v9 = vld [vmem:[#allocation2 + $0x8] sm:$0xff]  ;;  %v77_v12 = vld [vmem:[#allocation4 + $0x8] sm:$0xff]  ;;  %4464 = vmatprep.mubr.msk.f32.mxu0 %vm4994_vm1, %v4993_v14  ;;  %s4997_s28 = smov 120  }
  0x4b   :  { %4724 = vmatprep.subr.bf16.mxu1 %v4723_v3  ;;  %v75_v10 = vmul.f32 5.656854, %v73_v9  ;;  %v4219_v15 = vld [vmem:[#allocation7] ss:$0 sm:$0xff]  ;;  %vm174_vm2 = vcmask 64512   ;;  %s4998_s12 = smov 88  }
  0x4c   :  { %4726 = vmatpush3.bf16.msra.mxu1 %v4723_v3  ;;  %v5106_v11 = vadd.f32 %v76_v6, %v74_v8  ;;  %s4999_s1 = smov 56   ;;  %s5000_s13 = smov 112   ;;  %vm2001_vm3 = vcmask 523264   ;;  %vm3953_vm4 = vcmask 1041409   ;;  %vm4128_vm5 = vcmask 261127  }
  0x4d   :  { %4728 = vmatprep.subr.bf16.mxu1 %v4727_v7  ;;  %v5110_v13 = vadd.f32 %v77_v12, %v75_v10  ;;  %s5001_s14 = smov 80   ;;  %s5002_s15 = smov 48   ;;  %vm4132_vm6 = vcmask 253952   ;;  %vm4208_vm7 = vcmask 7175   ;;  %vm4210_vm8 = vcmask 0  }
  0x4e   :  { %4449 = vmatprep.mubr.msk.f32.mxu1 %vm89_vm0, %v5106_v11  ;;  %s5003_s16 = smov 72   ;;  %s5004_s17 = smov 104  }
  0x4f   :  { %s5005_s19 = smov 40  }
  0x50   :  { %4730 = vmatpush3.bf16.msra.mxu1 %v4727_v7 }
  0x51   :  { %4452 = vmatprep.subr.mxu1 %v4993_v14 }
  0x53   :  { %4450 = vmatmul.mubr.msk.f32.vlgmr.msra.gmra.mrb[0].mxu1 %vm89_vm0, %v5110_v13 }
  0x54   :  { %4454 = vmatprep.mubr.msk.f32.mxu1 %vm4994_vm1, %v4993_v14 }
 0x126   :  { %v4451_v16 = vpop.f32.mrb[0].mxu1 }
 0x127   :  { %v162_v17 = vpop.f32.mrb[1].mxu1  ;;  %v5124_v19 = vadd.f32 %v4451_v16, %v4219_v15 }
 0x128   :  { %v5120_v18 = vadd.f32 %v4219_v15, %v162_v17 }
 0x12a   :  { %172 = vrot.lane.b32.xlu0 %v5120_v18, %s4995_s3 }
 0x12e   :  { %250 = vrot.lane.b32.xlu0 %v5124_v19, %s4995_s3 }
 0x132   :  { %430 = vrot.lane.b32.xlu0 %v5124_v19, %s4996_s27 }
 0x136   :  { %585 = vrot.lane.b32.xlu0 %v5124_v19, %s4997_s28 }
 0x19c   :  { %v173_v20 = vpop.permute.xlu0 %172 }
 0x19d   :  { %4453 = vmatpush3.xpose.msk.msra.mxu1 %vm174_vm2, %v173_v20 }
 0x19e   :  { %4457 = vmatprep.subr.mxu1 %v4993_v14 }
 0x1a0   :  { %4455 = vmatmul.mubr.msk.f32.vlgmr.msra.gmra.mrb[2].mxu1 %vm174_vm2, %v5120_v18  ;;  %v251_v21 = vpop.permute.xlu0 %250 }
 0x1a1   :  { %4458 = vmatpush3.xpose.msk.msra.mxu1 %vm174_vm2, %v251_v21  ;;  %4459 = vmatprep.mubr.msk.f32.mxu1 %vm4994_vm1, %v4993_v14 }
 0x1a2   :  { %4467 = vmatprep.subr.mxu1 %v4993_v14 }
 0x1a4   :  { %4460 = vmatmul.mubr.msk.f32.vlgmr.msra.gmra.mrb[4].mxu1 %vm174_vm2, %v5124_v19  ;;  %v431_v22 = vpop.permute.xlu0 %430 }
 0x1a5   :  { %4468 = vmatpush3.msra.mxu1 %v431_v22  ;;  %4469 = vmatprep.mubr.msk.f32.mxu1 %vm4994_vm1, %v4993_v14 }
 0x1a6   :  { %4477 = vmatprep.subr.mxu1 %v4993_v14 }
 0x1a8   :  { %v586_v29 = vpop.permute.xlu0 %585 }
 0x273   :  { %v245_v23 = vpop.f32.mrb[2].mxu1 }
 0x274   :  { %v4456_v24 = vpop.f32.mrb[3].mxu1  ;;  %v326_v25 = vsel %vm174_vm2, %v245_v23, -inf }
 0x275   :  { %327 = vmax.xlane.f32.xlu0 %v326_v25 }
 0x277   :  { %v322_v26 = vpop.f32.mrb[4].mxu1 }
 0x278   :  { %v4461_v27 = vpop.f32.mrb[5].mxu1  ;;  %v329_v28 = vsel %vm174_vm2, %v322_v26, -inf }
 0x279   :  { %330 = vmax.xlane.f32.xlu1 %v329_v28 }
 0x28b   :  { %354 = vrot.lane.b32.xlu0 %v5120_v18, %s4996_s27 }
 0x28f   :  { %507 = vrot.lane.b32.xlu0 %v5120_v18, %s4997_s28 }
 0x302   :  { %v328_v30 = vpop.xlane.xlu0 %327 }
 0x303   :  { %v332_v37 = vsub.f32 %v245_v23, %v328_v30 }
 0x305   :  { %v334_v38 = vmul.f32 1.442695, %v332_v37 }
 0x306   :  { %v331_v31 = vpop.xlane.xlu1 %330  ;;  %v355_v32 = vpop.permute.xlu0 %354 }
 0x307   :  { %v333_v33 = vsub.f32 %v322_v26, %v331_v31  ;;  %4463 = vmatpush3.msra.mxu0 %v355_v32 }
 0x308   :  { %4472 = vmatprep.subr.mxu0 %v4993_v14 }
 0x309   :  { %v336_v34 = vmul.f32 1.442695, %v333_v33 }
 0x30a   :  { %v508_v55 = vpop.permute.xlu0 %507 }
 0x30b   :  { %4813 = vpow2.f32 %v336_v34 }
 0x30c   :  { %4815 = vpow2.f32 %v334_v38 }
 0x315   :  { %v4814_v35 = vpop.eup %4813 }
 0x316   :  { %v341_v36 = vsel %vm174_vm2, %v4814_v35, 0.0  ;;  %v4816_v39 = vpop.eup %4815 }
 0x317   :  { %342 = vadd.xlane.f32.xlu1 %v341_v36  ;;  %v338_v40 = vsel %vm174_vm2, %v4816_v39, 0.0  ;;  %v506_v36 = vld [vmem:[#allocation6 + $0x20] sm:$0xff] }
 0x328   :  { %587 = vrot.lane.b32.xlu1 %v5124_v19, %s4998_s12 }
 0x34c   :  { %339 = vadd.xlane.f32.xlu1 %v338_v40 }
 0x35d   :  { %509 = vrot.lane.b32.xlu1 %v5120_v18, %s4998_s12 }
 0x3a4   :  { %v343_v41 = vpop.xlane.xlu1 %342 }
 0x3a5   :  { %4817 = vrcp.f32 %v343_v41 }
 0x3a8   :  { %v588_v47 = vpop.permute.xlu1 %587 }
 0x3af   :  { %v4818_v42 = vpop.eup %4817 }
 0x3b0   :  { %v347_v43 = vmul.f32 %v4818_v42, %v343_v41 }
 0x3b2   :  { %v349_v44 = vsub.f32 2.0, %v347_v43 }
 0x3b4   :  { %v351_v45 = vmul.f32 %v4818_v42, %v349_v44 }
 0x3b6   :  { %v353_v46 = vmul.f32 %v4814_v35, %v351_v45  ;;  %v843_v35 = vld [vmem:[#allocation6 + $0x28] sm:$0xff] }
 0x3b8   :  { %4470 = vmatmul.mubr.msk.f32.vlgmr.msra.gmra.mrb[6].mxu1 %vm174_vm2, %v353_v46 }
 0x3b9   :  { %4478 = vmatpush3.xpose.msk.msra.mxu1 %vm174_vm2, %v588_v47  ;;  %4479 = vmatprep.mubr.msk.f32.mxu1 %vm4994_vm1, %v4993_v14 }
 0x3ba   :  { %4487 = vmatprep.subr.mxu1 %v4993_v14 }
 0x3bc   :  { %4480 = vmatmul.mubr.msk.f32.vlgmr.msra.gmra.mrb[8].mxu1 %vm174_vm2, %v586_v29 }
 0x3bd   :  { %4489 = vmatprep.mubr.msk.f32.mxu1 %vm4994_vm1, %v4993_v14 }
 0x3d9   :  { %v340_v48 = vpop.xlane.xlu1 %339 }
 0x3da   :  { %4819 = vrcp.f32 %v340_v48 }
 0x3dd   :  { %v510_v54 = vpop.permute.xlu1 %509 }
 0x3e4   :  { %v4820_v49 = vpop.eup %4819 }
 0x3e5   :  { %v346_v50 = vmul.f32 %v4820_v49, %v340_v48 }
 0x3e7   :  { %v348_v51 = vsub.f32 2.0, %v346_v50 }
 0x3e9   :  { %v350_v52 = vmul.f32 %v4820_v49, %v348_v51 }
 0x3eb   :  { %v352_v53 = vmul.f32 %v4816_v39, %v350_v52 }
 0x3ed   :  { %4465 = vmatmul.mubr.msk.f32.vlgmr.msra.gmra.mrb[0].mxu0 %vm174_vm2, %v352_v53 }
 0x3ee   :  { %4473 = vmatpush3.xpose.msk.msra.mxu0 %vm174_vm2, %v510_v54  ;;  %4474 = vmatprep.mubr.msk.f32.mxu0 %vm4994_vm1, %v4993_v14 }
 0x3ef   :  { %4482 = vmatprep.subr.mxu0 %v4993_v14 }
 0x3f1   :  { %4475 = vmatmul.mubr.msk.f32.vlgmr.msra.gmra.mrb[2].mxu0 %vm174_vm2, %v508_v55 }
 0x3f2   :  { %4484 = vmatprep.mubr.msk.f32.mxu0 %vm4994_vm1, %v4993_v14 }
 0x48b   :  { %v5174_v56 = vpop.f32.mrb[6].mxu1 }
 0x48c   :  { %v4471_v57 = vpop.f32.mrb[7].mxu1 }
 0x48f   :  { %v659_v58 = vpop.f32.mrb[8].mxu1 }
 0x490   :  { %v4481_v59 = vpop.f32.mrb[9].mxu1  ;;  %v666_v60 = vsel %vm174_vm2, %v659_v58, -inf }
 0x491   :  { %667 = vmax.xlane.f32.xlu0 %v666_v60 }
 0x4a7   :  { %767 = vrot.lane.b32.xlu0 %v5124_v19, %s4999_s1 }
 0x4ab   :  { %1006 = vrot.lane.b32.xlu0 %v5120_v18, %s5000_s13 }
 0x4af   :  { %1086 = vrot.lane.b32.xlu0 %v5124_v19, %s5001_s14 }
 0x4c0   :  { %v5183_v61 = vpop.f32.mrb[0].mxu0 }
 0x4c1   :  { %v4466_v62 = vpop.f32.mrb[1].mxu0 }
 0x4c4   :  { %v581_v63 = vpop.f32.mrb[2].mxu0 }
 0x4c5   :  { %v4476_v0 = vpop.f32.mrb[3].mxu0  ;;  %v663_v1 = vsel %vm174_vm2, %v581_v63, -inf }
 0x4ce   :  { %664 = vmax.xlane.f32.xlu0 %v663_v1 }
 0x4e4   :  { %691 = vrot.lane.b32.xlu0 %v5120_v18, %s4999_s1 }
 0x4e8   :  { %1190 = vrot.lane.b32.xlu0 %v5120_v18, %s5002_s15 }
 0x4ec   :  { %1428 = vrot.lane.b32.xlu0 %v5120_v18, %s5003_s16 }
 0x4f0   :  { %1506 = vrot.lane.b32.xlu0 %v5124_v19, %s5003_s16 }
 0x4f4   :  { %1426 = vrot.lane.b32.xlu0 %v5120_v18, %s5004_s17 }
 0x4f8   :  { %1504 = vrot.lane.b32.xlu0 %v5124_v19, %s5004_s17 }
 0x51e   :  { %v668_v2 = vpop.xlane.xlu0 %667 }
 0x51f   :  { %v670_v3 = vsub.f32 %v659_v58, %v668_v2 }
 0x521   :  { %v673_v4 = vmul.f32 1.442695, %v670_v3 }
 0x522   :  { %v768_v5 = vpop.permute.xlu0 %767 }
 0x523   :  { %4821 = vpow2.f32 %v673_v4  ;;  %4488 = vmatpush3.msra.mxu1 %v768_v5 }
 0x524   :  { %4502 = vmatprep.subr.mxu1 %v4993_v14 }
 0x526   :  { %v1007_v8 = vpop.permute.xlu0 %1006 }
 0x52a   :  { %v1087_v9 = vpop.permute.xlu0 %1086 }
 0x52d   :  { %v4822_v6 = vpop.eup %4821 }
 0x52e   :  { %v678_v7 = vsel %vm174_vm2, %v4822_v6, 0.0 }
 0x52f   :  { %679 = vadd.xlane.f32.xlu1 %v678_v7 }
 0x540   :  { %1008 = vrot.lane.b32.xlu1 %v5120_v18, %s5001_s14 }
 0x544   :  { %1084 = vrot.lane.b32.xlu1 %v5124_v19, %s5000_s13 }
 0x55b   :  { %v665_v10 = vpop.xlane.xlu0 %664 }
 0x55c   :  { %v669_v12 = vsub.f32 %v581_v63, %v665_v10 }
 0x55e   :  { %v671_v15 = vmul.f32 1.442695, %v669_v12 }
 0x55f   :  { %v692_v16 = vpop.permute.xlu0 %691 }
 0x560   :  { %4823 = vpow2.f32 %v671_v15  ;;  %4483 = vmatpush3.msra.mxu0 %v692_v16 }
 0x561   :  { %4492 = vmatprep.subr.mxu0 %v843_v35 }
 0x563   :  { %v1191_v47 = vpop.permute.xlu0 %1190 }
 0x567   :  { %v1429_v2 = vpop.permute.xlu0 %1428 }
 0x56a   :  { %v4824_v17 = vpop.eup %4823 }
 0x56b   :  { %v675_v20 = vsel %vm174_vm2, %v4824_v17, 0.0 }
 0x56c   :  { %676 = vadd.xlane.f32.xlu1 %v675_v20 }
 0x5bc   :  { %v680_v21 = vpop.xlane.xlu1 %679 }
 0x5bd   :  { %4825 = vrcp.f32 %v680_v21 }
 0x5c0   :  { %v1009_v27 = vpop.permute.xlu1 %1008 }
 0x5c4   :  { %v1085_v28 = vpop.permute.xlu1 %1084 }
 0x5c7   :  { %v4826_v22 = vpop.eup %4825 }
 0x5c8   :  { %v684_v23 = vmul.f32 %v4826_v22, %v680_v21 }
 0x5ca   :  { %v686_v24 = vsub.f32 2.0, %v684_v23 }
 0x5cc   :  { %v688_v25 = vmul.f32 %v4826_v22, %v686_v24 }
 0x5ce   :  { %v690_v26 = vmul.f32 %v4822_v6, %v688_v25 }
 0x5d0   :  { %4490 = vmatmul.mubr.msk.f32.vlgmr.msra.gmra.mrb[10].mxu1 %vm174_vm2, %v690_v26 }
 0x5d1   :  { %4503 = vmatpush3.xpose.msk.msra.mxu1 %vm174_vm2, %v1009_v27  ;;  %4504 = vmatprep.mubr.msk.f32.mxu1 %vm4994_vm1, %v4993_v14 }
 0x5d2   :  { %4507 = vmatprep.subr.mxu1 %v4993_v14 }
 0x5d4   :  { %4505 = vmatmul.mubr.msk.f32.vlgmr.msra.gmra.mrb[12].mxu1 %vm174_vm2, %v1007_v8  ;;  %v1507_v8 = vpop.permute.xlu0 %1506 }
 0x5d5   :  { %4508 = vmatpush3.xpose.msk.msra.mxu1 %vm174_vm2, %v1087_v9  ;;  %4509 = vmatprep.mubr.msk.f32.mxu1 %vm4994_vm1, %v4993_v14 }
 0x5d6   :  { %4517 = vmatprep.subr.mxu1 %v4993_v14 }
 0x5d8   :  { %4510 = vmatmul.mubr.msk.f32.vlgmr.msra.gmra.mrb[14].mxu1 %vm174_vm2, %v1085_v28  ;;  %v1427_v10 = vpop.permute.xlu0 %1426 }
 0x5d9   :  { %4519 = vmatprep.mubr.msk.f32.mxu1 %vm4994_vm1, %v4993_v14 }
 0x5dc   :  { %v1505_v20 = vpop.permute.xlu0 %1504 }
 0x5f9   :  { %v677_v29 = vpop.xlane.xlu1 %676 }
 0x5fa   :  { %4827 = vrcp.f32 %v677_v29 }
 0x604   :  { %v4828_v30 = vpop.eup %4827 }
 0x605   :  { %v683_v31 = vmul.f32 %v4828_v30, %v677_v29 }
 0x607   :  { %v685_v32 = vsub.f32 2.0, %v683_v31 }
 0x609   :  { %v687_v33 = vmul.f32 %v4828_v30, %v685_v32 }
 0x60b   :  { %v689_v34 = vmul.f32 %v4824_v17, %v687_v33 }
 0x60d   :  { %4485 = vmatmul.mubr.msk.f32.vlgmr.msra.gmra.mrb[4].mxu0 %vm174_vm2, %v689_v34 }
 0x60e   :  { %4493 = vmatpush3.msra.mxu0 %v843_v35 }
 0x60f   :  { %4497 = vmatprep.subr.mxu0 %v506_v36 }
 0x6a3   :  { %v839_v37 = vpop.f32.mrb[10].mxu1 }
 0x6a4   :  { %v4491_v38 = vpop.f32.mrb[11].mxu1 }
 0x6a7   :  { %v1080_v39 = vpop.f32.mrb[12].mxu1 }
 0x6a8   :  { %v4506_v40 = vpop.f32.mrb[13].mxu1  ;;  %v1162_v41 = vsel %vm174_vm2, %v1080_v39, -inf }
 0x6a9   :  { %1163 = vmax.xlane.f32.xlu1 %v1162_v41 }
 0x6ab   :  { %v1158_v42 = vpop.f32.mrb[14].mxu1 }
 0x6ac   :  { %v4511_v43 = vpop.f32.mrb[15].mxu1  ;;  %v1165_v44 = vsel %vm174_vm2, %v1158_v42, -inf }
 0x6ad   :  { %1166 = vmax.xlane.f32.xlu1 %v1165_v44  ;;  %v1762_v44 = vld [vmem:[#allocation6 + $0x38] sm:$0xff] }
 0x6e0   :  { %v763_v45 = vpop.f32.mrb[4].mxu0 }
 0x6e1   :  { %v4486_v46 = vpop.f32.mrb[5].mxu0  ;;  %4494 = vmatprep.mubr.msk.f32.mxu0 %vm174_vm2, %v763_v45 }
 0x6e2   :  { %4495 = vmatmul.mubr.msk.f32.vlgmr.msra.gmra.mrb[6].mxu0 %vm174_vm2, %v839_v37 }
 0x6e3   :  { %4499 = vmatprep.mubr.msk.f32.mxu0 %vm174_vm2, %v5183_v61  ;;  %4498 = vmatpush3.msra.mxu0 %v506_v36 }
 0x6e4   :  { %4512 = vmatprep.subr.mxu0 %v4993_v14 }
 0x6ea   :  { %4500 = vmatmul.mubr.msk.f32.vlgmr.msra.gmra.mrb[6].mxu0 %vm174_vm2, %v5174_v56  ;;  %v1342_v56 = vld [vmem:[#allocation6 + $0x30] sm:$0xff] }
 0x6eb   :  { %4513 = vmatpush3.msra.mxu0 %v1191_v47  ;;  %4514 = vmatprep.mubr.msk.f32.mxu0 %vm4994_vm1, %v4993_v14 }
 0x6ec   :  { %4522 = vmatprep.subr.mxu0 %v1342_v56 }
 0x736   :  { %v1164_v48 = vpop.xlane.xlu1 %1163 }
 0x737   :  { %v1168_v49 = vsub.f32 %v1080_v39, %v1164_v48 }
 0x739   :  { %v1170_v50 = vmul.f32 1.442695, %v1168_v49 }
 0x73a   :  { %v1167_v51 = vpop.xlane.xlu1 %1166 }
 0x73b   :  { %4829 = vpow2.f32 %v1170_v50  ;;  %v1169_v52 = vsub.f32 %v1158_v42, %v1167_v51 }
 0x73d   :  { %v1172_v53 = vmul.f32 1.442695, %v1169_v52 }
 0x73f   :  { %4831 = vpow2.f32 %v1172_v53 }
 0x745   :  { %v4830_v54 = vpop.eup %4829 }
 0x746   :  { %v1174_v55 = vsel %vm174_vm2, %v4830_v54, 0.0 }
 0x747   :  { %1175 = vadd.xlane.f32.xlu1 %v1174_v55 }
 0x749   :  { %v4832_v57 = vpop.eup %4831 }
 0x74a   :  { %v1177_v58 = vsel %vm174_vm2, %v4832_v57, 0.0 }
 0x74b   :  { %1178 = vadd.xlane.f32.xlu1 %v1177_v58 }
 0x75c   :  { %1266 = vrot.lane.b32.xlu1 %v5124_v19, %s5002_s15 }
 0x7d4   :  { %v1176_v59 = vpop.xlane.xlu1 %1175 }
 0x7d5   :  { %4833 = vrcp.f32 %v1176_v59 }
 0x7d8   :  { %v1179_v60 = vpop.xlane.xlu1 %1178 }
 0x7d9   :  { %4835 = vrcp.f32 %v1179_v60 }
 0x7dc   :  { %v1267_v61 = vpop.permute.xlu1 %1266 }
 0x7dd   :  { %4518 = vmatpush3.msra.mxu1 %v1267_v61 }
 0x7de   :  { %4527 = vmatprep.subr.mxu1 %v4993_v14 }
 0x7df   :  { %v4834_v62 = vpop.eup %4833 }
 0x7e0   :  { %v1182_v63 = vmul.f32 %v4834_v62, %v1176_v59 }
 0x7e2   :  { %v1184_v0 = vsub.f32 2.0, %v1182_v63 }
 0x7e3   :  { %v4836_v1 = vpop.eup %4835 }
 0x7e4   :  { %v1186_v3 = vmul.f32 %v4834_v62, %v1184_v0  ;;  %v1183_v4 = vmul.f32 %v4836_v1, %v1179_v60 }
 0x7e6   :  { %v1188_v5 = vmul.f32 %v4830_v54, %v1186_v3  ;;  %v1185_v6 = vsub.f32 2.0, %v1183_v4  ;;  %v4254_v54 = vld [vmem:[#allocation7 + $0x2] ss:$0 sm:$0xff] }
 0x7e8   :  { %v1187_v7 = vmul.f32 %v4836_v1, %v1185_v6  ;;  %4515 = vmatmul.mubr.msk.f32.vlgmr.msra.gmra.mrb[8].mxu0 %vm174_vm2, %v1188_v5 }
 0x7e9   :  { %4523 = vmatpush3.msra.mxu0 %v1342_v56 }
 0x7ea   :  { %v1189_v9 = vmul.f32 %v4832_v57, %v1187_v7  ;;  %4532 = vmatprep.subr.mxu0 %v4993_v14 }
 0x7ec   :  { %4520 = vmatmul.mubr.msk.f32.vlgmr.msra.gmra.mrb[16].mxu1 %vm174_vm2, %v1189_v9 }
 0x7ed   :  { %4528 = vmatpush3.xpose.msk.msra.mxu1 %vm174_vm2, %v1429_v2  ;;  %4529 = vmatprep.mubr.msk.f32.mxu1 %vm4994_vm1, %v4993_v14 }
 0x7ee   :  { %4537 = vmatprep.subr.mxu1 %v4993_v14 }
 0x7f0   :  { %4530 = vmatmul.mubr.msk.f32.vlgmr.msra.gmra.mrb[18].mxu1 %vm174_vm2, %v1427_v10  ;;  %v1898_v10 = vld [vmem:[#allocation6 + $0x50] sm:$0xff] }
 0x7f1   :  { %4539 = vmatprep.mubr.msk.f32.mxu1 %vm4994_vm1, %v4993_v14 }
 0x8bb   :  { %v1262_v12 = vpop.f32.mrb[8].mxu0 }
 0x8bc   :  { %v4516_v15 = vpop.f32.mrb[9].mxu0  ;;  %4524 = vmatprep.mubr.msk.f32.mxu0 %vm174_vm2, %v1262_v12  ;;  %v1899_v12 = vld [vmem:[#allocation6 + $0x58] sm:$0xff] }
 0x8bd   :  { %v4735_v15 = vpack.c.bf16 %v1899_v12, %v1898_v10 }
 0x8bf   :  { %v1338_v16 = vpop.f32.mrb[16].mxu1 }
 0x8c0   :  { %v4521_v17 = vpop.f32.mrb[17].mxu1  ;;  %4525 = vmatmul.mubr.msk.f32.vlgmr.msra.gmra.mrb[6].mxu0 %vm174_vm2, %v1338_v16  ;;  %v1988_v16 = vld [vmem:[#allocation6 + $0x60] sm:$0xff] }
 0x8c1   :  { %4533 = vmatpush3.xpose.msk.msra.mxu0 %vm174_vm2, %v1507_v8  ;;  %4534 = vmatprep.mubr.msk.f32.mxu0 %vm4994_vm1, %v4993_v14  ;;  %v1897_v8 = vld [vmem:[#allocation6 + $0x48] sm:$0xff] }
 0x8c2   :  { %4542 = vmatprep.subr.mxu0 %v4993_v14  ;;  %v1989_v17 = vld [vmem:[#allocation6 + $0x68] sm:$0xff] }
 0x8c3   :  { %v1500_v21 = vpop.f32.mrb[18].mxu1 }
 0x8c4   :  { %v4531_v22 = vpop.f32.mrb[19].mxu1  ;;  %4535 = vmatmul.mubr.msk.f32.vlgmr.msra.gmra.mrb[10].mxu0 %vm174_vm2, %v1505_v20  ;;  %v1582_v23 = vsel %vm174_vm2, %v1500_v21, -inf  ;;  %v1990_v20 = vld [vmem:[#allocation6 + $0x70] sm:$0xff] }
 0x8c5   :  { %1583 = vmax.xlane.f32.xlu1 %v1582_v23  ;;  %4544 = vmatprep.mubr.msk.f32.mxu0 %vm4994_vm1, %v4993_v14  ;;  %v1991_v22 = vld [vmem:[#allocation6 + $0x78] sm:$0xff] }
 0x8c6   :  { %v4743_v23 = vpack.c.bf16 %v1991_v22, %v1990_v20  ;;  %v4263_v22 = vld [vmem:[#allocation7 + $0x6] ss:$0 sm:$0xff] }
 0x952   :  { %v1584_v24 = vpop.xlane.xlu1 %1583 }
 0x953   :  { %v1588_v25 = vsub.f32 %v1500_v21, %v1584_v24  ;;  %v4739_v21 = vpack.c.bf16 %v1989_v17, %v1988_v16  ;;  %v1992_v24 = vld [vmem:[#allocation6 + $0x80] sm:$0xff] }
 0x955   :  { %v1590_v26 = vmul.f32 1.442695, %v1588_v25  ;;  %v1993_v25 = vld [vmem:[#allocation6 + $0x88] sm:$0xff] }
 0x957   :  { %4837 = vpow2.f32 %v1590_v26  ;;  %v4747_v26 = vpack.c.bf16 %v1993_v25, %v1992_v24 }
 0x961   :  { %v4838_v30 = vpop.eup %4837 }
 0x962   :  { %v1594_v31 = vsel %vm174_vm2, %v4838_v30, 0.0 }
 0x997   :  { %v1578_v27 = vpop.f32.mrb[10].mxu0 }
 0x998   :  { %v4536_v28 = vpop.f32.mrb[11].mxu0  ;;  %v1585_v29 = vsel %vm174_vm2, %v1578_v27, -inf }
 0x999   :  { %1586 = vmax.xlane.f32.xlu0 %v1585_v29 }
 0x99d   :  { %1595 = vadd.xlane.f32.xlu0 %v1594_v31 }
 0x9b3   :  { %1610 = vrot.lane.b32.xlu0 %v5120_v18, %s5005_s19 }
 0xa26   :  { %v1587_v32 = vpop.xlane.xlu0 %1586 }
 0xa27   :  { %v1589_v33 = vsub.f32 %v1578_v27, %v1587_v32 }
 0xa29   :  { %v1592_v34 = vmul.f32 1.442695, %v1589_v33 }
 0xa2a   :  { %v1596_v35 = vpop.xlane.xlu0 %1595 }
 0xa2b   :  { %4839 = vpow2.f32 %v1592_v34  ;;  %v4255_v34 = vld [vmem:[#allocation7 + $0x4] ss:$0 sm:$0xff] }
 0xa2c   :  { %4841 = vrcp.f32 %v1596_v35 }
 0xa2e   :  { %v1611_v36 = vpop.permute.xlu0 %1610 }
 0xa2f   :  { %4538 = vmatpush3.msra.mxu1 %v1611_v36 }
 0xa35   :  { %v4840_v37 = vpop.eup %4839 }
 0xa36   :  { %v4842_v38 = vpop.eup %4841  ;;  %v1597_v39 = vsel %vm174_vm2, %v4840_v37, 0.0 }
 0xa37   :  { %v1602_v40 = vmul.f32 %v4842_v38, %v1596_v35  ;;  %1598 = vadd.xlane.f32.xlu1 %v1597_v39 }
 0xa39   :  { %v1604_v41 = vsub.f32 2.0, %v1602_v40 }
 0xa3b   :  { %v1606_v42 = vmul.f32 %v4842_v38, %v1604_v41  ;;  %v4256_v38 = vld [vmem:[#allocation7 + $0x5] ss:$0 sm:$0xff] }
 0xa3d   :  { %v1608_v43 = vmul.f32 %v4838_v30, %v1606_v42 }
 0xa3f   :  { %4540 = vmatmul.mubr.msk.f32.vlgmr.msra.gmra.mrb[20].mxu1 %vm174_vm2, %v1608_v43  ;;  %v1994_v43 = vld [vmem:[#allocation6 + $0x90] sm:$0xff] }
 0xa48   :  { %1686 = vrot.lane.b32.xlu1 %v5124_v19, %s5005_s19 }
 0xac4   :  { %v1599_v18 = vpop.xlane.xlu1 %1598 }
 0xac5   :  { %4843 = vrcp.f32 %v1599_v18 }
 0xac8   :  { %v1687_v45 = vpop.permute.xlu1 %1686 }
 0xac9   :  { %4543 = vmatpush3.msra.mxu0 %v1687_v45  ;;  %v4257_v45 = vld [vmem:[#allocation7 + $0x1] ss:$0 sm:$0xff] }
 0xaca   :  { %4547 = vmatprep.subr.mxu0 %v1762_v44 }
 0xacf   :  { %v4844_v46 = vpop.eup %4843 }
 0xad0   :  { %v1603_v47 = vmul.f32 %v4844_v46, %v1599_v18  ;;  %v1995_v18 = vld [vmem:[#allocation6 + $0x98] sm:$0xff] }
 0xad2   :  { %v1605_v48 = vsub.f32 2.0, %v1603_v47 }
 0xad4   :  { %v1607_v49 = vmul.f32 %v4844_v46, %v1605_v48 }
 0xad6   :  { %v1609_v50 = vmul.f32 %v4840_v37, %v1607_v49 }
 0xad8   :  { %4545 = vmatmul.mubr.msk.f32.vlgmr.msra.gmra.mrb[12].mxu0 %vm174_vm2, %v1609_v50 }
 0xad9   :  { %4548 = vmatpush3.msra.mxu0 %v1762_v44  ;;  %v4751_v44 = vpack.c.bf16 %v1995_v18, %v1994_v43 }
 0xada   :  { %4740 = vmatprep.subr.bf16.mxu0 %v4739_v21 }
 0xb12   :  { %v1682_v51 = vpop.f32.mrb[20].mxu1 }
 0xb13   :  { %v4541_v52 = vpop.f32.mrb[21].mxu1  ;;  %4549 = vmatprep.mubr.msk.f32.mxu0 %vm174_vm2, %v1682_v51 }
 0xb14   :  { %v4260_v52 = vld [vmem:[#allocation7 + $0x3] ss:$0 sm:$0xff] }
 0xbab   :  { %v1758_v53 = vpop.f32.mrb[12].mxu0 }
 0xbac   :  { %v4546_v19 = vpop.f32.mrb[13].mxu0  ;;  %4550 = vmatmul.mubr.msk.f32.vlgmr.msra.gmra.mrb[6].mxu0 %vm174_vm2, %v1758_v53 }
 0xbad   :  { %4742 = vmatpush3.bf16.msra.mxu0 %v4739_v21 }
 0xbae   :  { %4744 = vmatprep.subr.bf16.mxu0 %v4743_v23 }
 0xbb1   :  { %4746 = vmatpush3.bf16.msra.mxu0 %v4743_v23 }
 0xbb2   :  { %4748 = vmatprep.subr.bf16.mxu0 %v4747_v26 }
 0xbb5   :  { %4750 = vmatpush3.bf16.msra.mxu0 %v4747_v26  ;;  %v4264_v26 = vld [vmem:[#allocation7 + $0x7] ss:$0 sm:$0xff] }
 0xbb6   :  { %4752 = vmatprep.subr.bf16.mxu0 %v4751_v44 }
 0xbb9   :  { %4754 = vmatpush3.bf16.msra.mxu0 %v4751_v44 }
 0xbba   :  { %4603 = vmatprep.subr.mxu0 %v4993_v14 }
 0xc7f   :  { %v4551_v55 = vpop.f32.mrb[6].mxu0 }
 0xc80   :  { %v1852_v57 = vadd.f32 %v4551_v55, %v4254_v54  ;;  %v1835_v58 = vpop.f32.mrb[7].mxu0 }
 0xc81   :  { %v1851_v56 = vadd.f32 %v4254_v54, %v1835_v58 }
 0xc82   :  { %v1854_v59 = vadd.f32 %v1852_v57, %v5110_v13 }
 0xc83   :  { %v1853_v60 = vadd.f32 %v1851_v56, %v5106_v11  ;;  %v1896_v11 = vld [vmem:[#allocation6 + $0x40] sm:$0xff] }
 0xc84   :  { %v1860_v61 = vsel %vm89_vm0, %v1854_v59, 0.0  ;;  %v4731_v9 = vpack.c.bf16 %v1897_v8, %v1896_v11  ;;  %v2128_v11 = vld [vmem:[#allocation6 + $0xb0] sm:$0xff]  ;;  %v2129_v8 = vld [vmem:[#allocation6 + $0xb8] sm:$0xff] }
 0xc85   :  { %1861 = vadd.xlane.f32.xlu0 %v1860_v61  ;;  %v1857_v62 = vsel %vm89_vm0, %v1853_v60, 0.0 }
 0xc86   :  { %1858 = vadd.xlane.f32.xlu1 %v1857_v62  ;;  %4732 = vmatprep.subr.bf16.mxu1 %v4731_v9 }
 0xc87   :  { %4734 = vmatpush3.bf16.msra.mxu1 %v4731_v9  ;;  %v4759_v9 = vpack.c.bf16 %v2129_v8, %v2128_v11 }
 0xc88   :  { %4736 = vmatprep.subr.bf16.mxu1 %v4735_v15 }
 0xc8b   :  { %4738 = vmatpush3.bf16.msra.mxu1 %v4735_v15 }
 0xd12   :  { %v1862_v63 = vpop.xlane.xlu0 %1861 }
 0xd13   :  { %v1865_v0 = vmul.f32 0.03125, %v1862_v63  ;;  %v1859_v1 = vpop.xlane.xlu1 %1858 }
 0xd14   :  { %v1864_v2 = vmul.f32 0.03125, %v1859_v1 }
 0xd15   :  { %v1867_v3 = vsub.f32 %v1854_v59, %v1865_v0 }
 0xd16   :  { %v1866_v4 = vsub.f32 %v1853_v60, %v1864_v2 }
 0xd17   :  { %v1869_v5 = vmul.f32 %v1867_v3, %v1867_v3 }
 0xd18   :  { %v1868_v6 = vmul.f32 %v1866_v4, %v1866_v4 }
 0xd19   :  { %v1873_v7 = vsel %vm89_vm0, %v1869_v5, 0.0 }
 0xd1a   :  { %1874 = vadd.xlane.f32.xlu1 %v1873_v7  ;;  %v1870_v13 = vsel %vm89_vm0, %v1868_v6, 0.0  ;;  %v2126_v6 = vld [vmem:[#allocation6 + $0xa0] sm:$0xff]  ;;  %v2127_v7 = vld [vmem:[#allocation6 + $0xa8] sm:$0xff] }
 0xd1b   :  { %1871 = vadd.xlane.f32.xlu0 %v1870_v13  ;;  %v4755_v13 = vpack.c.bf16 %v2127_v7, %v2126_v6 }
 0xd1d   :  { %4756 = vmatprep.subr.bf16.mxu1 %v4755_v13 }
 0xda7   :  { %v1875_v27 = vpop.xlane.xlu1 %1874 }
 0xda8   :  { %v1877_v28 = vmul.f32 0.03125, %v1875_v27  ;;  %v1872_v29 = vpop.xlane.xlu0 %1871 }
 0xda9   :  { %v1876_v30 = vmul.f32 0.03125, %v1872_v29 }
 0xdaa   :  { %v1879_v31 = vadd.f32 1e-05, %v1877_v28 }
 0xdab   :  { %v1878_v32 = vadd.f32 1e-05, %v1876_v30 }
 0xdac   :  { %4845 = vrsqrt.f32 %v1879_v31  ;;  %v4265_v31 = vld [vmem:[#allocation7 + $0x10] ss:$0 sm:$0xff] }
 0xdad   :  { %4847 = vrsqrt.f32 %v1878_v32 }
 0xdb6   :  { %v4846_v33 = vpop.eup %4845 }
 0xdb7   :  { %v4848_v35 = vpop.eup %4847  ;;  %v1883_v36 = vmul.f32 %v4846_v33, %v1867_v3 }
 0xdb8   :  { %v1882_v37 = vmul.f32 %v4848_v35, %v1866_v4 }
 0xdb9   :  { %v1889_v39 = vmul.f32 %v4255_v34, %v1883_v36 }
 0xdba   :  { %v1888_v40 = vmul.f32 %v4255_v34, %v1882_v37 }
 0xdbb   :  { %v1895_v42 = vadd.f32 %v4256_v38, %v1889_v39 }
 0xdbc   :  { %v1894_v41 = vadd.f32 %v4256_v38, %v1888_v40 }
 0xdbe   :  { %4560 = vmatprep.mubr.msk.f32.mxu1 %vm89_vm0, %v1894_v41 }
 0xdbf   :  { %4561 = vmatmul.mubr.msk.f32.vlgmr.msra.gmra.mrb[22].mxu1 %vm89_vm0, %v1895_v42 }
 0xdc0   :  { %4758 = vmatpush3.bf16.msra.mxu1 %v4755_v13 }
 0xdc1   :  { %4760 = vmatprep.subr.bf16.mxu1 %v4759_v9 }
 0xdc4   :  { %4762 = vmatpush3.bf16.msra.mxu1 %v4759_v9 }
 0xdc5   :  { %4593 = vmatprep.subr.mxu1 %v4993_v14 }
 0xe92   :  { %v4562_v46 = vpop.f32.mrb[22].mxu1 }
 0xe93   :  { %v1983_v47 = vadd.f32 %v4562_v46, %v4257_v45  ;;  %v1977_v48 = vpop.f32.mrb[23].mxu1 }
 0xe94   :  { %v1978_v49 = vadd.f32 %v4257_v45, %v1977_v48 }
 0xe95   :  { %v1987_v51 = vmax.f32 %v1983_v47, 0.0 }
 0xe96   :  { %v1986_v50 = vmax.f32 %v1978_v49, 0.0 }
 0xe98   :  { %4579 = vmatprep.mubr.msk.f32.mxu0 %vm2001_vm3, %v1986_v50 }
 0xe99   :  { %4580 = vmatmul.mubr.msk.f32.vlgmr.msra.gmra.mrb[14].mxu0 %vm2001_vm3, %v1987_v51 }
 0xe9a   :  { %4605 = vmatprep.mubr.msk.f32.mxu0 %vm4994_vm1, %v4993_v14 }
 0xf6c   :  { %v4581_v53 = vpop.f32.mrb[14].mxu0 }
 0xf6d   :  { %v2080_v19 = vadd.f32 %v4581_v53, %v4260_v52  ;;  %v2074_v54 = vpop.f32.mrb[15].mxu0 }
 0xf6e   :  { %v2075_v55 = vadd.f32 %v4260_v52, %v2074_v54 }
 0xf6f   :  { %v2084_v57 = vadd.f32 %v2080_v19, %v1895_v42 }
 0xf70   :  { %v2083_v58 = vadd.f32 %v2075_v55, %v1894_v41 }
 0xf71   :  { %v2090_v56 = vsel %vm89_vm0, %v2084_v57, 0.0 }
 0xf72   :  { %2091 = vadd.xlane.f32.xlu1 %v2090_v56  ;;  %v2087_v59 = vsel %vm89_vm0, %v2083_v58, 0.0 }
 0xf73   :  { %2088 = vadd.xlane.f32.xlu0 %v2087_v59 }
 0xfff   :  { %v2092_v60 = vpop.xlane.xlu1 %2091 }
0x1000   :  { %v2094_v61 = vmul.f32 0.03125, %v2092_v60  ;;  %v2089_v62 = vpop.xlane.xlu0 %2088 }
0x1001   :  { %v2093_v63 = vmul.f32 0.03125, %v2089_v62 }
0x1002   :  { %v2096_v0 = vsub.f32 %v2084_v57, %v2094_v61 }
0x1003   :  { %v2095_v1 = vsub.f32 %v2083_v58, %v2093_v63 }
0x1004   :  { %v2098_v2 = vmul.f32 %v2096_v0, %v2096_v0 }
0x1005   :  { %v2097_v3 = vmul.f32 %v2095_v1, %v2095_v1 }
0x1006   :  { %v2102_v4 = vsel %vm89_vm0, %v2098_v2, 0.0 }
0x1007   :  { %2103 = vadd.xlane.f32.xlu1 %v2102_v4  ;;  %v2099_v5 = vsel %vm89_vm0, %v2097_v3, 0.0 }
0x1008   :  { %2100 = vadd.xlane.f32.xlu0 %v2099_v5 }
0x1094   :  { %v2104_v10 = vpop.xlane.xlu1 %2103 }
0x1095   :  { %v2106_v12 = vmul.f32 0.03125, %v2104_v10  ;;  %v2101_v15 = vpop.xlane.xlu0 %2100 }
0x1096   :  { %v2105_v16 = vmul.f32 0.03125, %v2101_v15 }
0x1097   :  { %v2108_v17 = vadd.f32 1e-05, %v2106_v12 }
0x1098   :  { %v2107_v20 = vadd.f32 1e-05, %v2105_v16 }
0x1099   :  { %4849 = vrsqrt.f32 %v2108_v17 }
0x109a   :  { %4851 = vrsqrt.f32 %v2107_v20 }
0x10a3   :  { %v4850_v21 = vpop.eup %4849 }
0x10a4   :  { %v4852_v23 = vpop.eup %4851  ;;  %v2112_v24 = vmul.f32 %v4850_v21, %v2096_v0 }
0x10a5   :  { %v2111_v25 = vmul.f32 %v4852_v23, %v2095_v1 }
0x10a6   :  { %v2118_v27 = vmul.f32 %v4263_v22, %v2112_v24 }
0x10a7   :  { %v2117_v28 = vmul.f32 %v4263_v22, %v2111_v25 }
0x10a8   :  { %v5286_v30 = vadd.f32 %v4264_v26, %v2118_v27 }
0x10a9   :  { %v5284_v29 = vadd.f32 %v4264_v26, %v2117_v28 }
0x10ab   :  { %4590 = vmatprep.mubr.msk.f32.mxu1 %vm89_vm0, %v5284_v29 }
0x10ac   :  { %4591 = vmatmul.mubr.msk.f32.vlgmr.msra.gmra.mrb[24].mxu1 %vm89_vm0, %v5286_v30 }
0x10ad   :  { %4595 = vmatprep.mubr.msk.f32.mxu1 %vm4994_vm1, %v4993_v14 }
0x117f   :  { %v4592_v32 = vpop.f32.mrb[24].mxu1 }
0x1180   :  { %v5294_v33 = vadd.f32 %v4592_v32, %v4265_v31  ;;  %v2208_v34 = vpop.f32.mrb[25].mxu1 }
0x1181   :  { %v5296_v35 = vadd.f32 %v4265_v31, %v2208_v34 }
0x1182   :  { %2295 = vrot.lane.b32.xlu1 %v5294_v33, %s4995_s3 }
0x1183   :  { %2218 = vrot.lane.b32.xlu0 %v5296_v35, %s4995_s3 }
0x11f4   :  { %v2296_v37 = vpop.permute.xlu1 %2295 }
0x11f5   :  { %v2219_v36 = vpop.permute.xlu0 %2218 }
0x11f6   :  { %4594 = vmatpush3.xpose.msk.msra.mxu1 %vm174_vm2, %v2219_v36 }
0x11f7   :  { %4598 = vmatprep.subr.mxu1 %v4993_v14 }
0x11f9   :  { %4596 = vmatmul.mubr.msk.f32.vlgmr.msra.gmra.mrb[26].mxu1 %vm174_vm2, %v5296_v35 }
0x11fa   :  { %4599 = vmatpush3.xpose.msk.msra.mxu1 %vm174_vm2, %v2296_v37  ;;  %4600 = vmatprep.mubr.msk.f32.mxu1 %vm4994_vm1, %v4993_v14 }
0x11fb   :  { %4608 = vmatprep.subr.mxu1 %v4993_v14 }
0x11fd   :  { %4601 = vmatmul.mubr.msk.f32.vlgmr.msra.gmra.mrb[28].mxu1 %vm174_vm2, %v5294_v33 }
0x11fe   :  { %4610 = vmatprep.mubr.msk.f32.mxu1 %vm4994_vm1, %v4993_v14 }
0x12cc   :  { %v2290_v38 = vpop.f32.mrb[26].mxu1 }
0x12cd   :  { %v4597_v39 = vpop.f32.mrb[27].mxu1  ;;  %v2371_v47 = vsel %vm174_vm2, %v2290_v38, -inf }
0x12d0   :  { %v2367_v40 = vpop.f32.mrb[28].mxu1 }
0x12d1   :  { %v4602_v41 = vpop.f32.mrb[29].mxu1  ;;  %v2374_v42 = vsel %vm174_vm2, %v2367_v40, -inf }
0x12d2   :  { %2375 = vmax.xlane.f32.xlu1 %v2374_v42 }
0x12e3   :  { %2632 = vrot.lane.b32.xlu1 %v5294_v33, %s4998_s12 }
0x12e7   :  { %2630 = vrot.lane.b32.xlu1 %v5294_v33, %s4997_s28 }
0x135f   :  { %v2376_v43 = vpop.xlane.xlu1 %2375 }
0x1360   :  { %v2378_v18 = vsub.f32 %v2367_v40, %v2376_v43 }
0x1362   :  { %v2381_v44 = vmul.f32 1.442695, %v2378_v18 }
0x1363   :  { %v2633_v19 = vpop.permute.xlu1 %2632 }
0x1364   :  { %4853 = vpow2.f32 %v2381_v44 }
0x1367   :  { %v2631_v55 = vpop.permute.xlu1 %2630 }
0x136e   :  { %v4854_v45 = vpop.eup %4853 }
0x136f   :  { %v2386_v46 = vsel %vm174_vm2, %v4854_v45, 0.0 }
0x1370   :  { %2387 = vadd.xlane.f32.xlu0 %v2386_v46 }
0x1386   :  { %2475 = vrot.lane.b32.xlu0 %v5294_v33, %s4996_s27 }
0x13a5   :  { %2372 = vmax.xlane.f32.xlu0 %v2371_v47 }
0x13bb   :  { %2399 = vrot.lane.b32.xlu0 %v5296_v35, %s4996_s27 }
0x13bf   :  { %2552 = vrot.lane.b32.xlu0 %v5296_v35, %s4997_s28 }
0x13fd   :  { %v2388_v48 = vpop.xlane.xlu0 %2387 }
0x13fe   :  { %4855 = vrcp.f32 %v2388_v48 }
0x1401   :  { %v2476_v49 = vpop.permute.xlu0 %2475 }
0x1402   :  { %4609 = vmatpush3.msra.mxu1 %v2476_v49 }
0x1403   :  { %4618 = vmatprep.subr.mxu1 %v4993_v14 }
0x1408   :  { %v4856_v50 = vpop.eup %4855 }
0x1409   :  { %v2392_v51 = vmul.f32 %v4856_v50, %v2388_v48 }
0x140b   :  { %v2394_v52 = vsub.f32 2.0, %v2392_v51 }
0x140d   :  { %v2396_v53 = vmul.f32 %v4856_v50, %v2394_v52 }
0x140f   :  { %v2398_v54 = vmul.f32 %v4854_v45, %v2396_v53 }
0x1411   :  { %4611 = vmatmul.mubr.msk.f32.vlgmr.msra.gmra.mrb[30].mxu1 %vm174_vm2, %v2398_v54 }
0x1412   :  { %4619 = vmatpush3.xpose.msk.msra.mxu1 %vm174_vm2, %v2633_v19  ;;  %4620 = vmatprep.mubr.msk.f32.mxu1 %vm4994_vm1, %v4993_v14 }
0x1413   :  { %4628 = vmatprep.subr.mxu1 %v4993_v14 }
0x1415   :  { %4621 = vmatmul.mubr.msk.f32.vlgmr.msra.gmra.mrb[32].mxu1 %vm174_vm2, %v2631_v55 }
0x1416   :  { %4630 = vmatprep.mubr.msk.f32.mxu1 %vm4994_vm1, %v4993_v14 }
0x1432   :  { %v2373_v57 = vpop.xlane.xlu0 %2372 }
0x1433   :  { %v2377_v58 = vsub.f32 %v2290_v38, %v2373_v57 }
0x1435   :  { %v2379_v56 = vmul.f32 1.442695, %v2377_v58  ;;  %v2888_v58 = vld [vmem:[#allocation6 + $0xc8] sm:$0xff] }
0x1436   :  { %v2400_v59 = vpop.permute.xlu0 %2399 }
0x1437   :  { %4857 = vpow2.f32 %v2379_v56  ;;  %4604 = vmatpush3.msra.mxu0 %v2400_v59  ;;  %v2551_v56 = vld [vmem:[#allocation6 + $0xc0] sm:$0xff] }
0x1438   :  { %4613 = vmatprep.subr.mxu0 %v4993_v14 }
0x143a   :  { %v2553_v7 = vpop.permute.xlu0 %2552 }
0x1441   :  { %v4858_v60 = vpop.eup %4857 }
0x1442   :  { %v2383_v61 = vsel %vm174_vm2, %v4858_v60, 0.0 }
0x1443   :  { %2384 = vadd.xlane.f32.xlu1 %v2383_v61 }
0x1454   :  { %2554 = vrot.lane.b32.xlu1 %v5296_v35, %s4998_s12 }
0x14d0   :  { %v2385_v62 = vpop.xlane.xlu1 %2384 }
0x14d1   :  { %4859 = vrcp.f32 %v2385_v62 }
0x14d4   :  { %v2555_v4 = vpop.permute.xlu1 %2554 }
0x14db   :  { %v4860_v63 = vpop.eup %4859 }
0x14dc   :  { %v2391_v0 = vmul.f32 %v4860_v63, %v2385_v62 }
0x14de   :  { %v2393_v1 = vsub.f32 2.0, %v2391_v0 }
0x14e0   :  { %v2395_v2 = vmul.f32 %v4860_v63, %v2393_v1 }
0x14e2   :  { %v2397_v3 = vmul.f32 %v4858_v60, %v2395_v2 }
0x14e4   :  { %4606 = vmatmul.mubr.msk.f32.vlgmr.msra.gmra.mrb[16].mxu0 %vm174_vm2, %v2397_v3  ;;  %v5341_v5 = vpop.f32.mrb[30].mxu1 }
0x14e5   :  { %4614 = vmatpush3.xpose.msk.msra.mxu0 %vm174_vm2, %v2555_v4  ;;  %v4612_v6 = vpop.f32.mrb[31].mxu1  ;;  %4615 = vmatprep.mubr.msk.f32.mxu0 %vm4994_vm1, %v4993_v14 }
0x14e6   :  { %4623 = vmatprep.subr.mxu0 %v4993_v14 }
0x14e8   :  { %4616 = vmatmul.mubr.msk.f32.vlgmr.msra.gmra.mrb[18].mxu0 %vm174_vm2, %v2553_v7  ;;  %v2704_v13 = vpop.f32.mrb[32].mxu1 }
0x14e9   :  { %v4622_v11 = vpop.f32.mrb[33].mxu1  ;;  %v2711_v8 = vsel %vm174_vm2, %v2704_v13, -inf  ;;  %4625 = vmatprep.mubr.msk.f32.mxu0 %vm4994_vm1, %v4993_v14 }
0x14ea   :  { %2712 = vmax.xlane.f32.xlu1 %v2711_v8 }
0x14fb   :  { %3053 = vrot.lane.b32.xlu1 %v5296_v35, %s5001_s14 }
0x14ff   :  { %3051 = vrot.lane.b32.xlu1 %v5296_v35, %s5000_s13 }
0x1503   :  { %3129 = vrot.lane.b32.xlu1 %v5294_v33, %s5000_s13 }
0x1577   :  { %v2713_v9 = vpop.xlane.xlu1 %2712 }
0x1578   :  { %v2715_v10 = vsub.f32 %v2704_v13, %v2713_v9  ;;  %v3387_v13 = vld [vmem:[#allocation6 + $0xd0] sm:$0xff] }
0x157a   :  { %v2718_v12 = vmul.f32 1.442695, %v2715_v10 }
0x157b   :  { %v3054_v31 = vpop.permute.xlu1 %3053 }
0x157c   :  { %4861 = vpow2.f32 %v2718_v12 }
0x157f   :  { %v3052_v36 = vpop.permute.xlu1 %3051 }
0x1583   :  { %v3130_v38 = vpop.permute.xlu1 %3129 }
0x1586   :  { %v4862_v15 = vpop.eup %4861 }
0x1587   :  { %v2723_v16 = vsel %vm174_vm2, %v4862_v15, 0.0 }
0x1588   :  { %2724 = vadd.xlane.f32.xlu0 %v2723_v16 }
0x159e   :  { %2812 = vrot.lane.b32.xlu0 %v5294_v33, %s4999_s1 }
0x15a2   :  { %3131 = vrot.lane.b32.xlu0 %v5294_v33, %s5001_s14 }
0x15b7   :  { %v5362_v17 = vpop.f32.mrb[16].mxu0 }
0x15b8   :  { %v4607_v20 = vpop.f32.mrb[17].mxu0 }
0x15bb   :  { %v2626_v21 = vpop.f32.mrb[18].mxu0 }
0x15bc   :  { %v4617_v22 = vpop.f32.mrb[19].mxu0  ;;  %v2708_v23 = vsel %vm174_vm2, %v2626_v21, -inf }
0x15c1   :  { %2709 = vmax.xlane.f32.xlu0 %v2708_v23 }
0x15d7   :  { %2736 = vrot.lane.b32.xlu0 %v5296_v35, %s4999_s1 }
0x15db   :  { %3235 = vrot.lane.b32.xlu0 %v5296_v35, %s5002_s15 }
0x15df   :  { %3473 = vrot.lane.b32.xlu0 %v5296_v35, %s5003_s16 }
0x15e3   :  { %3551 = vrot.lane.b32.xlu0 %v5294_v33, %s5003_s16 }
0x15e7   :  { %3471 = vrot.lane.b32.xlu0 %v5296_v35, %s5004_s17 }
0x15eb   :  { %3549 = vrot.lane.b32.xlu0 %v5294_v33, %s5004_s17 }
0x1615   :  { %v2725_v24 = vpop.xlane.xlu0 %2724 }
0x1616   :  { %4863 = vrcp.f32 %v2725_v24 }
0x1619   :  { %v2813_v25 = vpop.permute.xlu0 %2812 }
0x161a   :  { %4629 = vmatpush3.msra.mxu1 %v2813_v25 }
0x161b   :  { %4643 = vmatprep.subr.mxu1 %v4993_v14 }
0x161d   :  { %v3132_v37 = vpop.permute.xlu0 %3131 }
0x1620   :  { %v4864_v26 = vpop.eup %4863 }
0x1621   :  { %v2729_v27 = vmul.f32 %v4864_v26, %v2725_v24 }
0x1623   :  { %v2731_v28 = vsub.f32 2.0, %v2729_v27 }
0x1625   :  { %v2733_v32 = vmul.f32 %v4864_v26, %v2731_v28 }
0x1627   :  { %v2735_v34 = vmul.f32 %v4862_v15, %v2733_v32 }
0x1629   :  { %4631 = vmatmul.mubr.msk.f32.vlgmr.msra.gmra.mrb[34].mxu1 %vm174_vm2, %v2735_v34 }
0x162a   :  { %4644 = vmatpush3.xpose.msk.msra.mxu1 %vm174_vm2, %v3054_v31  ;;  %4645 = vmatprep.mubr.msk.f32.mxu1 %vm4994_vm1, %v4993_v14 }
0x162b   :  { %4648 = vmatprep.subr.mxu1 %v4993_v14 }
0x162d   :  { %4646 = vmatmul.mubr.msk.f32.vlgmr.msra.gmra.mrb[36].mxu1 %vm174_vm2, %v3052_v36 }
0x162e   :  { %4649 = vmatpush3.xpose.msk.msra.mxu1 %vm174_vm2, %v3132_v37  ;;  %4650 = vmatprep.mubr.msk.f32.mxu1 %vm4994_vm1, %v4993_v14 }
0x162f   :  { %4658 = vmatprep.subr.mxu1 %v4993_v14 }
0x1631   :  { %4651 = vmatmul.mubr.msk.f32.vlgmr.msra.gmra.mrb[38].mxu1 %vm174_vm2, %v3130_v38 }
0x1632   :  { %4660 = vmatprep.mubr.msk.f32.mxu1 %vm4994_vm1, %v4993_v14 }
0x164e   :  { %v2710_v39 = vpop.xlane.xlu0 %2709 }
0x164f   :  { %v2714_v40 = vsub.f32 %v2626_v21, %v2710_v39 }
0x1651   :  { %v2716_v41 = vmul.f32 1.442695, %v2714_v40 }
0x1652   :  { %v2737_v42 = vpop.permute.xlu0 %2736 }
0x1653   :  { %4865 = vpow2.f32 %v2716_v41  ;;  %4624 = vmatpush3.msra.mxu0 %v2737_v42 }
0x1654   :  { %4633 = vmatprep.subr.mxu0 %v2888_v58 }
0x1656   :  { %v3236_v11 = vpop.permute.xlu0 %3235 }
0x165a   :  { %v3474_v20 = vpop.permute.xlu0 %3473 }
0x165d   :  { %v4866_v43 = vpop.eup %4865 }
0x165e   :  { %v2720_v18 = vsel %vm174_vm2, %v4866_v43, 0.0  ;;  %v3552_v25 = vpop.permute.xlu0 %3551 }
0x165f   :  { %2721 = vadd.xlane.f32.xlu1 %v2720_v18 }
0x1662   :  { %v3472_v27 = vpop.permute.xlu0 %3471 }
0x1666   :  { %v3550_v36 = vpop.permute.xlu0 %3549 }
0x16ec   :  { %v2722_v44 = vpop.xlane.xlu1 %2721 }
0x16ed   :  { %4867 = vrcp.f32 %v2722_v44 }
0x16f7   :  { %v4868_v45 = vpop.eup %4867 }
0x16f8   :  { %v2728_v46 = vmul.f32 %v4868_v45, %v2722_v44 }
0x16fa   :  { %v2730_v47 = vsub.f32 2.0, %v2728_v46 }
0x16fc   :  { %v2732_v48 = vmul.f32 %v4868_v45, %v2730_v47  ;;  %v2884_v49 = vpop.f32.mrb[34].mxu1 }
0x16fd   :  { %v4632_v50 = vpop.f32.mrb[35].mxu1 }
0x16fe   :  { %v2734_v51 = vmul.f32 %v4866_v43, %v2732_v48 }
0x1700   :  { %4626 = vmatmul.mubr.msk.f32.vlgmr.msra.gmra.mrb[20].mxu0 %vm174_vm2, %v2734_v51  ;;  %v3125_v52 = vpop.f32.mrb[36].mxu1 }
0x1701   :  { %v4647_v53 = vpop.f32.mrb[37].mxu1  ;;  %v3207_v19 = vsel %vm174_vm2, %v3125_v52, -inf  ;;  %4634 = vmatpush3.msra.mxu0 %v2888_v58 }
0x1702   :  { %3208 = vmax.xlane.f32.xlu1 %v3207_v19  ;;  %4638 = vmatprep.subr.mxu0 %v2551_v56 }
0x1704   :  { %v3203_v54 = vpop.f32.mrb[38].mxu1 }
0x1705   :  { %v4652_v55 = vpop.f32.mrb[39].mxu1  ;;  %v3210_v57 = vsel %vm174_vm2, %v3203_v54, -inf }
0x1706   :  { %3211 = vmax.xlane.f32.xlu1 %v3210_v57 }
0x178f   :  { %v3209_v59 = vpop.xlane.xlu1 %3208 }
0x1790   :  { %v3213_v60 = vsub.f32 %v3125_v52, %v3209_v59 }
0x1792   :  { %v3215_v61 = vmul.f32 1.442695, %v3213_v60 }
0x1793   :  { %v3212_v62 = vpop.xlane.xlu1 %3211 }
0x1794   :  { %4869 = vpow2.f32 %v3215_v61  ;;  %v3214_v63 = vsub.f32 %v3203_v54, %v3212_v62 }
0x1796   :  { %v3217_v0 = vmul.f32 1.442695, %v3214_v63 }
0x1798   :  { %4871 = vpow2.f32 %v3217_v0 }
0x179e   :  { %v4870_v1 = vpop.eup %4869 }
0x179f   :  { %v3219_v2 = vsel %vm174_vm2, %v4870_v1, 0.0 }
0x17a0   :  { %3220 = vadd.xlane.f32.xlu1 %v3219_v2 }
0x17a2   :  { %v4872_v3 = vpop.eup %4871 }
0x17a3   :  { %v3222_v4 = vsel %vm174_vm2, %v4872_v3, 0.0 }
0x17a4   :  { %3223 = vadd.xlane.f32.xlu1 %v3222_v4  ;;  %v4300_v4 = vld [vmem:[#allocation7 + $0x12] ss:$0 sm:$0xff] }
0x17b5   :  { %3311 = vrot.lane.b32.xlu1 %v5294_v33, %s5002_s15 }
0x17d3   :  { %v2808_v6 = vpop.f32.mrb[20].mxu0 }
0x17d4   :  { %v4627_v7 = vpop.f32.mrb[21].mxu0  ;;  %4635 = vmatprep.mubr.msk.f32.mxu0 %vm174_vm2, %v2808_v6 }
0x17d5   :  { %4636 = vmatmul.mubr.msk.f32.vlgmr.msra.gmra.mrb[22].mxu0 %vm174_vm2, %v2884_v49 }
0x17d6   :  { %4640 = vmatprep.mubr.msk.f32.mxu0 %vm174_vm2, %v5362_v17  ;;  %4639 = vmatpush3.msra.mxu0 %v2551_v56  ;;  %v3807_v56 = vld [vmem:[#allocation6 + $0xd8] sm:$0xff] }
0x17d7   :  { %4653 = vmatprep.subr.mxu0 %v4993_v14 }
0x17dd   :  { %4641 = vmatmul.mubr.msk.f32.vlgmr.msra.gmra.mrb[22].mxu0 %vm174_vm2, %v5341_v5 }
0x17de   :  { %4654 = vmatpush3.msra.mxu0 %v3236_v11  ;;  %4655 = vmatprep.mubr.msk.f32.mxu0 %vm4994_vm1, %v4993_v14 }
0x17df   :  { %4663 = vmatprep.subr.mxu0 %v3387_v13 }
0x182d   :  { %v3221_v8 = vpop.xlane.xlu1 %3220 }
0x182e   :  { %4873 = vrcp.f32 %v3221_v8 }
0x1831   :  { %v3224_v9 = vpop.xlane.xlu1 %3223 }
0x1832   :  { %4875 = vrcp.f32 %v3224_v9 }
0x1835   :  { %v3312_v10 = vpop.permute.xlu1 %3311 }
0x1836   :  { %4659 = vmatpush3.msra.mxu1 %v3312_v10 }
0x1837   :  { %4668 = vmatprep.subr.mxu1 %v4993_v14 }
0x1838   :  { %v4874_v12 = vpop.eup %4873 }
0x1839   :  { %v3227_v15 = vmul.f32 %v4874_v12, %v3221_v8 }
0x183b   :  { %v3229_v16 = vsub.f32 2.0, %v3227_v15 }
0x183c   :  { %v4876_v17 = vpop.eup %4875 }
0x183d   :  { %v3231_v21 = vmul.f32 %v4874_v12, %v3229_v16  ;;  %v3228_v5 = vmul.f32 %v4876_v17, %v3224_v9 }
0x183f   :  { %v3233_v22 = vmul.f32 %v4870_v1, %v3231_v21  ;;  %v3230_v23 = vsub.f32 2.0, %v3228_v5 }
0x1841   :  { %v3232_v24 = vmul.f32 %v4876_v17, %v3230_v23  ;;  %4656 = vmatmul.mubr.msk.f32.vlgmr.msra.gmra.mrb[24].mxu0 %vm174_vm2, %v3233_v22 }
0x1842   :  { %4664 = vmatpush3.msra.mxu0 %v3387_v13 }
0x1843   :  { %v3234_v26 = vmul.f32 %v4872_v3, %v3232_v24  ;;  %4673 = vmatprep.subr.mxu0 %v4993_v14  ;;  %v3941_v24 = vld [vmem:[#allocation6 + $0xe8] sm:$0xff] }
0x1845   :  { %4661 = vmatmul.mubr.msk.f32.vlgmr.msra.gmra.mrb[40].mxu1 %vm174_vm2, %v3234_v26  ;;  %v5006_v26 = vmov 0.0|0.0  }
0x1846   :  { %4669 = vmatpush3.xpose.msk.msra.mxu1 %vm174_vm2, %v3474_v20  ;;  %4670 = vmatprep.mubr.msk.f32.mxu1 %vm4994_vm1, %v4993_v14 }
0x1847   :  { %4678 = vmatprep.subr.mxu1 %v4993_v14 }
0x1849   :  { %4671 = vmatmul.mubr.msk.f32.vlgmr.msra.gmra.mrb[42].mxu1 %vm174_vm2, %v3472_v27 }
0x184a   :  { %4680 = vmatprep.mubr.msk.f32.mxu1 %vm4994_vm1, %v4993_v14 }
0x1914   :  { %v3307_v28 = vpop.f32.mrb[24].mxu0 }
0x1915   :  { %v4657_v31 = vpop.f32.mrb[25].mxu0  ;;  %4665 = vmatprep.mubr.msk.f32.mxu0 %vm174_vm2, %v3307_v28  ;;  %v3943_v28 = vld [vmem:[#allocation6 + $0xf8] sm:$0xff] }
0x1918   :  { %v3383_v32 = vpop.f32.mrb[40].mxu1 }
0x1919   :  { %v4662_v34 = vpop.f32.mrb[41].mxu1  ;;  %4666 = vmatmul.mubr.msk.f32.vlgmr.msra.gmra.mrb[22].mxu0 %vm174_vm2, %v3383_v32  ;;  %v4028_v32 = vld [vmem:[#allocation6 + $0x100] sm:$0xff] }
0x191a   :  { %4674 = vmatpush3.xpose.msk.msra.mxu0 %vm174_vm2, %v3552_v25  ;;  %4675 = vmatprep.mubr.msk.f32.mxu0 %vm4994_vm1, %v4993_v14  ;;  %v3942_v25 = vld [vmem:[#allocation6 + $0xf0] sm:$0xff]  ;;  %v4029_v34 = vld [vmem:[#allocation6 + $0x108] sm:$0xff] }
0x191b   :  { %4683 = vmatprep.subr.mxu0 %v4993_v14  ;;  %v4767_v31 = vpack.c.bf16 %v3943_v28, %v3942_v25 }
0x191c   :  { %v3545_v37 = vpop.f32.mrb[42].mxu1 }
0x191d   :  { %v4672_v38 = vpop.f32.mrb[43].mxu1  ;;  %4676 = vmatmul.mubr.msk.f32.vlgmr.msra.gmra.mrb[26].mxu0 %vm174_vm2, %v3550_v36  ;;  %v3627_v39 = vsel %vm174_vm2, %v3545_v37, -inf  ;;  %v4030_v36 = vld [vmem:[#allocation6 + $0x110] sm:$0xff] }
0x191e   :  { %3628 = vmax.xlane.f32.xlu1 %v3627_v39  ;;  %4685 = vmatprep.mubr.msk.f32.mxu0 %vm4994_vm1, %v4993_v14  ;;  %v4031_v38 = vld [vmem:[#allocation6 + $0x118] sm:$0xff] }
0x191f   :  { %v4773_v39 = vpack.c.bf16 %v4031_v38, %v4030_v36  ;;  %v4307_v36 = vld [vmem:[#allocation7 + $0x16] ss:$0 sm:$0xff]  ;;  %v4308_v38 = vld [vmem:[#allocation7 + $0x17] ss:$0 sm:$0xff] }
0x19ab   :  { %v3629_v40 = vpop.xlane.xlu1 %3628 }
0x19ac   :  { %v3633_v41 = vsub.f32 %v3545_v37, %v3629_v40  ;;  %v4770_v37 = vpack.c.bf16 %v4029_v34, %v4028_v32  ;;  %v4032_v40 = vld [vmem:[#allocation6 + $0x120] sm:$0xff] }
0x19ae   :  { %v3635_v42 = vmul.f32 1.442695, %v3633_v41  ;;  %v4033_v41 = vld [vmem:[#allocation6 + $0x128] sm:$0xff] }
0x19b0   :  { %4877 = vpow2.f32 %v3635_v42  ;;  %v4776_v42 = vpack.c.bf16 %v4033_v41, %v4032_v40  ;;  %v4309_v40 = vld [vmem:[#allocation7 + $0x18] ss:$0 sm:$0xff] }
0x19ba   :  { %v4878_v45 = vpop.eup %4877 }
0x19bb   :  { %v3639_v46 = vsel %vm174_vm2, %v4878_v45, 0.0 }
0x19f0   :  { %v3623_v43 = vpop.f32.mrb[26].mxu0 }
0x19f1   :  { %v4677_v18 = vpop.f32.mrb[27].mxu0  ;;  %v3630_v44 = vsel %vm174_vm2, %v3623_v43, -inf }
0x19f2   :  { %3631 = vmax.xlane.f32.xlu0 %v3630_v44 }
0x19f6   :  { %3640 = vadd.xlane.f32.xlu0 %v3639_v46 }
0x1a0c   :  { %3655 = vrot.lane.b32.xlu0 %v5296_v35, %s5005_s19 }
0x1a7f   :  { %v3632_v47 = vpop.xlane.xlu0 %3631 }
0x1a80   :  { %v3634_v48 = vsub.f32 %v3623_v43, %v3632_v47 }
0x1a82   :  { %v3637_v49 = vmul.f32 1.442695, %v3634_v48 }
0x1a83   :  { %v3641_v50 = vpop.xlane.xlu0 %3640 }
0x1a84   :  { %4879 = vpow2.f32 %v3637_v49  ;;  %v4301_v49 = vld [vmem:[#allocation7 + $0x14] ss:$0 sm:$0xff] }
0x1a85   :  { %4881 = vrcp.f32 %v3641_v50 }
0x1a87   :  { %v3656_v51 = vpop.permute.xlu0 %3655 }
0x1a88   :  { %4679 = vmatpush3.msra.mxu1 %v3656_v51 }
0x1a89   :  { %4763 = vmatprep.subr.bf16.mxu1 %v5006_v26 }
0x1a8e   :  { %v4880_v52 = vpop.eup %4879 }
0x1a8f   :  { %v4882_v53 = vpop.eup %4881  ;;  %v3642_v19 = vsel %vm174_vm2, %v4880_v52, 0.0 }
0x1a90   :  { %v3647_v54 = vmul.f32 %v4882_v53, %v3641_v50  ;;  %3643 = vadd.xlane.f32.xlu1 %v3642_v19 }
0x1a92   :  { %v3649_v55 = vsub.f32 2.0, %v3647_v54 }
0x1a94   :  { %v3651_v57 = vmul.f32 %v4882_v53, %v3649_v55  ;;  %v4302_v53 = vld [vmem:[#allocation7 + $0x15] ss:$0 sm:$0xff] }
0x1a96   :  { %v3653_v58 = vmul.f32 %v4878_v45, %v3651_v57 }
0x1a98   :  { %4681 = vmatmul.mubr.msk.f32.vlgmr.msra.gmra.mrb[44].mxu1 %vm174_vm2, %v3653_v58 }
0x1a99   :  { %4701 = vmatprep.mubr.msk.f32.mxu1 %vm4994_vm1, %v4993_v14 }
0x1aa1   :  { %3731 = vrot.lane.b32.xlu1 %v5294_v33, %s5005_s19 }
0x1b1d   :  { %v3644_v35 = vpop.xlane.xlu1 %3643 }
0x1b1e   :  { %4883 = vrcp.f32 %v3644_v35 }
0x1b21   :  { %v3732_v59 = vpop.permute.xlu1 %3731 }
0x1b22   :  { %4684 = vmatpush3.msra.mxu0 %v3732_v59  ;;  %v4034_v59 = vld [vmem:[#allocation6 + $0x130] sm:$0xff] }
0x1b23   :  { %4688 = vmatprep.subr.mxu0 %v3807_v56 }
0x1b28   :  { %v4884_v60 = vpop.eup %4883 }
0x1b29   :  { %v3648_v61 = vmul.f32 %v4884_v60, %v3644_v35 }
0x1b2b   :  { %v3650_v62 = vsub.f32 2.0, %v3648_v61 }
0x1b2d   :  { %v3652_v63 = vmul.f32 %v4884_v60, %v3650_v62  ;;  %v4035_v60 = vld [vmem:[#allocation6 + $0x138] sm:$0xff]  ;;  %v4303_v62 = vld [vmem:[#allocation7 + $0x11] ss:$0 sm:$0xff] }
0x1b2e   :  { %v4779_v61 = vpack.c.bf16 %v4035_v60, %v4034_v59 }
0x1b2f   :  { %v3654_v0 = vmul.f32 %v4880_v52, %v3652_v63 }
0x1b31   :  { %4686 = vmatmul.mubr.msk.f32.vlgmr.msra.gmra.mrb[28].mxu0 %vm174_vm2, %v3654_v0 }
0x1b32   :  { %4689 = vmatpush3.msra.mxu0 %v3807_v56 }
0x1b33   :  { %4769 = vmatprep.subr.bf16.mxu0 %v5006_v26 }
0x1b6b   :  { %v3727_v1 = vpop.f32.mrb[44].mxu1 }
0x1b6c   :  { %v4682_v2 = vpop.f32.mrb[45].mxu1  ;;  %4690 = vmatprep.mubr.msk.f32.mxu0 %vm174_vm2, %v3727_v1 }
0x1c04   :  { %v3803_v3 = vpop.f32.mrb[28].mxu0 }
0x1c05   :  { %v4687_v33 = vpop.f32.mrb[29].mxu0  ;;  %4691 = vmatmul.mubr.msk.f32.vlgmr.msra.gmra.mrb[22].mxu0 %vm174_vm2, %v3803_v3  ;;  %v4305_v3 = vld [vmem:[#allocation7 + $0x13] ss:$0 sm:$0xff] }
0x1c06   :  { %4720 = vmatprep.mubr.msk.f32.mxu0 %vm4994_vm1, %v4993_v14  ;;  %4771 = vmatpush3.bf16.msra.mxu0 %v4770_v37 }
0x1c07   :  { %4772 = vmatprep.subr.bf16.mxu0 %v5006_v26 }
0x1c0a   :  { %4774 = vmatpush3.bf16.msra.mxu0 %v4773_v39 }
0x1c0b   :  { %4775 = vmatprep.subr.bf16.mxu0 %v5006_v26 }
0x1c0e   :  { %4777 = vmatpush3.bf16.msra.mxu0 %v4776_v42 }
0x1c0f   :  { %4778 = vmatprep.subr.bf16.mxu0 %v5006_v26 }
0x1c12   :  { %4780 = vmatpush3.bf16.msra.mxu0 %v4779_v61 }
0x1cd8   :  { %v4692_v6 = vpop.f32.mrb[22].mxu0 }
0x1cd9   :  { %v3897_v7 = vadd.f32 %v4692_v6, %v4300_v4  ;;  %v3880_v13 = vpop.f32.mrb[23].mxu0 }
0x1cda   :  { %v3896_v11 = vadd.f32 %v4300_v4, %v3880_v13 }
0x1cdb   :  { %v3899_v8 = vadd.f32 %v3897_v7, %v5286_v30 }
0x1cdc   :  { %v3898_v9 = vadd.f32 %v3896_v11, %v5284_v29  ;;  %v3940_v29 = vld [vmem:[#allocation6 + $0xe0] sm:$0xff] }
0x1cdd   :  { %v3905_v10 = vsel %vm89_vm0, %v3899_v8, 0.0  ;;  %v4764_v27 = vpack.c.bf16 %v3941_v24, %v3940_v29 }
0x1cde   :  { %3906 = vadd.xlane.f32.xlu0 %v3905_v10  ;;  %v3902_v12 = vsel %vm89_vm0, %v3898_v9, 0.0 }
0x1cdf   :  { %3903 = vadd.xlane.f32.xlu1 %v3902_v12  ;;  %4765 = vmatpush3.bf16.msra.mxu1 %v4764_v27 }
0x1ce0   :  { %4766 = vmatprep.subr.bf16.mxu1 %v5006_v26 }
0x1ce3   :  { %4768 = vmatpush3.bf16.msra.mxu1 %v4767_v31 }
0x1d6b   :  { %v3907_v15 = vpop.xlane.xlu0 %3906 }
0x1d6c   :  { %v3909_v16 = vmul.f32 0.03125, %v3907_v15  ;;  %v3904_v17 = vpop.xlane.xlu1 %3903 }
0x1d6d   :  { %v3908_v20 = vmul.f32 0.03125, %v3904_v17 }
0x1d6e   :  { %v3911_v14 = vsub.f32 %v3899_v8, %v3909_v16 }
0x1d6f   :  { %v3910_v21 = vsub.f32 %v3898_v9, %v3908_v20 }
0x1d70   :  { %v3913_v5 = vmul.f32 %v3911_v14, %v3911_v14 }
0x1d71   :  { %v3912_v22 = vmul.f32 %v3910_v21, %v3910_v21 }
0x1d72   :  { %v3917_v23 = vsel %vm89_vm0, %v3913_v5, 0.0 }
0x1d73   :  { %3918 = vadd.xlane.f32.xlu1 %v3917_v23  ;;  %v3914_v30 = vsel %vm89_vm0, %v3912_v22, 0.0 }
0x1d74   :  { %3915 = vadd.xlane.f32.xlu0 %v3914_v30 }
0x1e00   :  { %v3919_v43 = vpop.xlane.xlu1 %3918 }
0x1e01   :  { %v3921_v18 = vmul.f32 0.03125, %v3919_v43  ;;  %v3916_v44 = vpop.xlane.xlu0 %3915 }
0x1e02   :  { %v3920_v45 = vmul.f32 0.03125, %v3916_v44 }
0x1e03   :  { %v3923_v46 = vadd.f32 1e-05, %v3921_v18 }
0x1e04   :  { %v3922_v47 = vadd.f32 1e-05, %v3920_v45 }
0x1e05   :  { %4885 = vrsqrt.f32 %v3923_v46 }
0x1e06   :  { %4887 = vrsqrt.f32 %v3922_v47 }
0x1e0f   :  { %v4886_v48 = vpop.eup %4885 }
0x1e10   :  { %v4888_v50 = vpop.eup %4887  ;;  %v3927_v51 = vmul.f32 %v4886_v48, %v3911_v14 }
0x1e11   :  { %v3926_v52 = vmul.f32 %v4888_v50, %v3910_v21 }
0x1e12   :  { %v3933_v19 = vmul.f32 %v4301_v49, %v3927_v51  ;;  %v4310_v51 = vld [vmem:[#allocation7 + $0x19] ss:$0 sm:$0xff] }
0x1e13   :  { %v3932_v54 = vmul.f32 %v4301_v49, %v3926_v52 }
0x1e14   :  { %v3939_v55 = vadd.f32 %v4302_v53, %v3933_v19 }
0x1e15   :  { %v3938_v57 = vadd.f32 %v4302_v53, %v3932_v54 }
0x1e16   :  { %v3952_v58 = vrot.slane %v3939_v55, 6 }
0x1e17   :  { %v3951_v35 = vrot.slane %v3938_v57, 7 }
0x1e19   :  { %v3954_v56 = vsel %vm3953_vm4, %v3952_v58, %v3951_v35 }
0x1e1a   :  { %4702 = vmatmul.mubr.msk.f32.vlgmr.msra.gmra.mrb[46].mxu1 %vm89_vm0, %v3954_v56 }
0x1eed   :  { %v4023_v63 = vpop.f32.mrb[46].mxu1 }
0x1eee   :  { %v4024_v0 = vadd.f32 %v4303_v62, %v4023_v63  ;;  %v4703_v1 = vpop.f32.mrb[47].mxu1 }
0x1ef0   :  { %v4027_v2 = vmax.f32 %v4024_v0, 0.0 }
0x1ef2   :  { %4721 = vmatmul.mubr.msk.f32.vlgmr.msra.gmra.mrb[30].mxu0 %vm2001_vm3, %v4027_v2 }
0x1fc5   :  { %v4110_v33 = vpop.f32.mrb[30].mxu0 }
0x1fc6   :  { %v4111_v4 = vadd.f32 %v4305_v3, %v4110_v33  ;;  %v4722_v6 = vpop.f32.mrb[31].mxu0 }
0x1fc8   :  { %v4115_v7 = vrot.slane %v4111_v4, 1  ;;  %v4116_v13 = vrot.slane %v4111_v4, 2 }
0x1fca   :  { %v4119_v11 = vadd.f32 %v4115_v7, %v3938_v57  ;;  %v4120_v8 = vadd.f32 %v4116_v13, %v3939_v55 }
0x1fcc   :  { %v4129_v9 = vsel %vm4128_vm5, %v4119_v11, 0.0  ;;  %v4125_v10 = vrot.slane %v4120_v8, 7 }
0x1fcd   :  { %4130 = vadd.xlane.f32.xlu1 %v4129_v9 }
0x1fce   :  { %v4133_v12 = vsel %vm4132_vm6, %v4125_v10, 0.0 }
0x1fcf   :  { %4134 = vadd.xlane.f32.xlu0 %v4133_v12 }
0x205a   :  { %v4131_v15 = vpop.xlane.xlu1 %4130 }
0x205b   :  { %v4136_v16 = vmul.f32 0.03125, %v4131_v15 }
0x205c   :  { %v4135_v17 = vpop.xlane.xlu0 %4134 }
0x205d   :  { %v4143_v20 = vsub.f32 %v4119_v11, %v4136_v16  ;;  %v4137_v14 = vmul.f32 0.03125, %v4135_v17 }
0x205f   :  { %v4140_v21 = vrot.slane %v4137_v14, 1  ;;  %v4145_v5 = vmul.f32 %v4143_v20, %v4143_v20 }
0x2061   :  { %v4144_v22 = vsub.f32 %v4120_v8, %v4140_v21  ;;  %v4152_v23 = vsel %vm4128_vm5, %v4145_v5, 0.0 }
0x2062   :  { %4153 = vadd.xlane.f32.xlu1 %v4152_v23 }
0x2063   :  { %v4146_v30 = vmul.f32 %v4144_v22, %v4144_v22 }
0x2065   :  { %v4149_v29 = vrot.slane %v4146_v30, 7 }
0x2067   :  { %v4155_v24 = vsel %vm4132_vm6, %v4149_v29, 0.0 }
0x2068   :  { %4156 = vadd.xlane.f32.xlu0 %v4155_v24 }
0x20ef   :  { %v4154_v25 = vpop.xlane.xlu1 %4153 }
0x20f0   :  { %v4158_v26 = vmul.f32 0.03125, %v4154_v25 }
0x20f2   :  { %v4160_v27 = vadd.f32 1e-05, %v4158_v26 }
0x20f4   :  { %4889 = vrsqrt.f32 %v4160_v27 }
0x20f5   :  { %v4157_v28 = vpop.xlane.xlu0 %4156 }
0x20f6   :  { %v4159_v31 = vmul.f32 0.03125, %v4157_v28 }
0x20f8   :  { %v4161_v32 = vadd.f32 1e-05, %v4159_v31 }
0x20fa   :  { %4891 = vrsqrt.f32 %v4161_v32 }
0x20fe   :  { %v4890_v34 = vpop.eup %4889 }
0x20ff   :  { %v4169_v37 = vmul.f32 %v4890_v34, %v4143_v20 }
0x2101   :  { %v4175_v39 = vmul.f32 %v4307_v36, %v4169_v37 }
0x2103   :  { %v4181_v41 = vadd.f32 %v4308_v38, %v4175_v39 }
0x2104   :  { %v4892_v42 = vpop.eup %4891 }
0x2105   :  { %v4166_v43 = vrot.slane %v4892_v42, 1  ;;  %v4189_v18 = vmul.f32 %v4309_v40, %v4181_v41 }
0x2107   :  { %v4170_v44 = vmul.f32 %v4166_v43, %v4144_v22  ;;  %v4196_v45 = vsel %vm4128_vm5, %v4189_v18, 0.0 }
0x2108   :  { %4197 = vadd.xlane.f32.xlu0 %v4196_v45 }
0x2109   :  { %v4176_v46 = vmul.f32 %v4307_v36, %v4170_v44 }
0x210b   :  { %v4182_v47 = vadd.f32 %v4308_v38, %v4176_v46 }
0x210d   :  { %v4190_v48 = vmul.f32 %v4309_v40, %v4182_v47 }
0x210f   :  { %v4193_v49 = vrot.slane %v4190_v48, 7 }
0x2111   :  { %v4199_v50 = vsel %vm4132_vm6, %v4193_v49, 0.0 }
0x2112   :  { %4200 = vadd.xlane.f32.xlu1 %v4199_v50 }
0x2195   :  { %v4198_v52 = vpop.xlane.xlu0 %4197 }
0x2196   :  { %v4206_v53 = vadd.f32 %v4310_v51, %v4198_v52 }
0x2198   :  { %4209 = vst.msk [vmem:[%s5468_s4 - $0x7] sm:$0x80] %vm4208_vm7, %v4206_v53 }
0x219f   :  { %v4201_v19 = vpop.xlane.xlu1 %4200 }
0x21a0   :  { %v4207_v54 = vadd.f32 %v4310_v51, %v4201_v19 }
0x21a2   :  { %4211 = vst.msk [vmem:[%s5468_s4 + $0x1] sm:$0x1] %vm4210_vm8, %v4207_v54 }
0x21a3   :  { %4216 = vsyncpa [#allocation3], 1 }
0x21a4   :  { %4217 = vsyncpa [#allocation5], 1 }
0x21a5   :  { %4218 = vsyncpa [#allocation8], 1 }

</bundles_post_ra>
